<compile_context>
chip_gen: v7x
topology: tpu7x:2x2x1
jax: 0.10.0
libtpu: 0.0.40
codegen_flags: <defaults>
</compile_context>

<pallas_src>
import functools

import jax
import jax.numpy as jnp
from jax import lax
from jax.experimental import pallas as pl
from jax.experimental.pallas import tpu as pltpu


def _layer_norm(x, w, b, eps=1e-6):
    # x: (R, D) fp32, w/b: (1, D). Biased variance, matches torch.nn.LayerNorm.
    mean = jnp.mean(x, axis=-1, keepdims=True)
    xc = x - mean
    var = jnp.mean(xc * xc, axis=-1, keepdims=True)
    return xc * lax.rsqrt(var + eps) * w + b


def _gelu_tanh(x):
    # tanh-approximate GELU (torch nn.GELU default is erf-based; max abs diff ~1e-3).
    c = 0.7978845608028654  # sqrt(2/pi)
    return 0.5 * x * (1.0 + jnp.tanh(c * (x + 0.044715 * x * x * x)))


def _transformer_kernel(heads,
                        xq_ref, xkv_ref,
                        ln1w_ref, ln1b_ref,
                        wq_ref, wkv_ref, wp_ref, bp_ref,
                        ln2w_ref, ln2b_ref,
                        w1_ref, b1_ref, w2_ref, b2_ref,
                        o_ref,
                        ctx_ref):
    f32 = jnp.float32
    xq = xq_ref[0].astype(f32)       # (TQ, D) query tile (also the residual stream)
    xkv = xkv_ref[0].astype(f32)     # (N, D)  full sequence for K/V
    D = xq.shape[-1]
    dh = D // heads
    cdt = wq_ref.dtype               # MXU operand dtype (bf16 if params are bf16)

    # ---- LayerNorm1 (fp32) ----
    ln1w = ln1w_ref[...].astype(f32)
    ln1b = ln1b_ref[...].astype(f32)
    xq_n = _layer_norm(xq, ln1w, ln1b).astype(cdt)
    # K/V are recomputed per query tile; fine for moderate N, a 2-pass/KV-cached
    # variant would amortize this for very long sequences.
    xkv_n = _layer_norm(xkv, ln1w, ln1b).astype(cdt)

    # ---- projections (fp32 accumulation) ----
    q = jnp.dot(xq_n, wq_ref[...], preferred_element_type=f32).astype(cdt)    # (TQ, D)
    kv = jnp.dot(xkv_n, wkv_ref[...], preferred_element_type=f32)             # (N, 2D)
    k = kv[:, :D].astype(cdt)
    v = kv[:, D:].astype(cdt)

    # ---- per-head attention; context goes into VMEM scratch (no concat) ----
    for h in range(heads):
        sl = slice(h * dh, (h + 1) * dh)
        qh = q[:, sl]                                   # (TQ, dh)
        kh = k[:, sl]                                   # (N, dh)
        vh = v[:, sl]                                   # (N, dh)
        # scores: contract last dims of both operands -> no explicit kh.T relayout.
        dots = lax.dot_general(qh, kh, (((1,), (1,)), ((), ())),
                               preferred_element_type=f32)          # (TQ, N)
        m = jnp.max(dots, axis=-1, keepdims=True)
        e = jnp.exp(dots - m)
        s = jnp.sum(e, axis=-1, keepdims=True)
        p = e * pl.reciprocal(s, approx=True)                       # softmax probs
        ctx_ref[:, sl] = jnp.dot(p.astype(cdt), vh,
                                 preferred_element_type=f32).astype(ctx_ref.dtype)

    ctx = ctx_ref[...].astype(cdt)                                  # (TQ, D)
    attn_out = (jnp.dot(ctx, wp_ref[...], preferred_element_type=f32)
                + bp_ref[...].astype(f32))

    # ---- residual 1 ----
    y = xq + attn_out

    # ---- LayerNorm2 + MLP ----
    ln2w = ln2w_ref[...].astype(f32)
    ln2b = ln2b_ref[...].astype(f32)
    y_n = _layer_norm(y, ln2w, ln2b).astype(cdt)

    h1 = (jnp.dot(y_n, w1_ref[...], preferred_element_type=f32)
          + b1_ref[...].astype(f32))                                # (TQ, 4D)
    h1 = _gelu_tanh(h1).astype(cdt)
    mlp_out = (jnp.dot(h1, w2_ref[...], preferred_element_type=f32)
               + b2_ref[...].astype(f32))                           # (TQ, D)

    # ---- residual 2 ----
    o_ref[0] = (y + mlp_out).astype(o_ref.dtype)


def transformer_forward(x, params, *, heads):
    """x: (B, N, D). Params use PyTorch nn.Linear layout (out_features, in_features)."""
    (ln1_w, ln1_b, wq, wkv, wp, bp, ln2_w, ln2_b, w1, b1, w2, b2) = params
    B, N, D = x.shape
    assert D % heads == 0, "dim must be divisible by heads"
    H4 = w1.shape[0]

    # Query-tile size: 128 when it divides N (MXU-width tile), otherwise one tile
    # spanning the full (small) sequence.  TODO(synk): pad D to a 128 multiple for
    # lane-dense stores when the model dim is not 128-aligned.
    tq = 128 if (N % 128 == 0) else N
    nq = N // tq

    # Host-side pre-transposes so the kernel does plain  activations @ W.
    wq_t = wq.T                  # (D, D)
    wkv_t = wkv.T                # (D, 2D): cols [0:D]=K, [D:2D]=V (matches chunk(2))
    wp_t = wp.T                  # (D, D)
    w1_t = w1.T                  # (D, 4D)
    w2_t = w2.T                  # (4D, D)
    row = lambda a: a.reshape(1, -1)

    const = lambda shape: pl.BlockSpec(shape, lambda b, qi: (0, 0))

    return pl.pallas_call(
        functools.partial(_transformer_kernel, heads),
        out_shape=jax.ShapeDtypeStruct((B, N, D), x.dtype),
        grid=(B, nq),
        in_specs=[
            pl.BlockSpec((1, tq, D), lambda b, qi: (b, qi, 0)),   # x: query tile
            pl.BlockSpec((1, N, D), lambda b, qi: (b, 0, 0)),     # x: full seq (K/V)
            const((1, D)), const((1, D)),                         # ln1 w, b
            const((D, D)), const((D, 2 * D)),                     # wq_t, wkv_t
            const((D, D)), const((1, D)),                         # wp_t, proj bias
            const((1, D)), const((1, D)),                         # ln2 w, b
            const((D, H4)), const((1, H4)),                       # fc1 w, b
            const((H4, D)), const((1, D)),                        # fc2 w, b
        ],
        out_specs=pl.BlockSpec((1, tq, D), lambda b, qi: (b, qi, 0)),
        scratch_shapes=[pltpu.VMEM((tq, D), jnp.float32)],        # per-tile attn context
        compiler_params=pltpu.CompilerParams(
            dimension_semantics=("parallel", "parallel")),
    )(x, x,
      row(ln1_w), row(ln1_b),
      wq_t, wkv_t, wp_t, row(bp),
      row(ln2_w), row(ln2_b),
      w1_t, row(b1), w2_t, row(b2))


def _reference(x, params, *, heads):
    """Pure-JAX mirror of the PyTorch Transformer.forward (eval mode)."""
    (ln1_w, ln1_b, wq, wkv, wp, bp, ln2_w, ln2_b, w1, b1, w2, b2) = params
    B, N, D = x.shape
    dh = D // heads

    def ln(t, w, b, eps=1e-6):
        m = t.mean(-1, keepdims=True)
        v = ((t - m) ** 2).mean(-1, keepdims=True)
        return (t - m) / jnp.sqrt(v + eps) * w + b

    xn = ln(x, ln1_w, ln1_b)
    q = xn @ wq.T
    kv = xn @ wkv.T
    k, v = kv[..., :D], kv[..., D:]

    def split(t):
        return t.reshape(B, N, heads, dh).transpose(0, 2, 1, 3)   # (B, H, N, dh)

    qh, kh, vh = map(split, (q, k, v))
    dots = jnp.einsum("bhnd,bhmd->bhnm", qh, kh)                  # no 1/sqrt(d) scaling
    attn = jax.nn.softmax(dots, axis=-1)
    out = jnp.einsum("bhnm,bhmd->bhnd", attn, vh)
    out = out.transpose(0, 2, 1, 3).reshape(B, N, D)
    y = x + (out @ wp.T + bp)

    yn = ln(y, ln2_w, ln2_b)
    h = _gelu_tanh(yn @ w1.T + b1)
    return y + (h @ w2.T + b2)


if __name__ == "__main__":
    B, N, D, HEADS = 2, 8, 32, 8          # dim=32, heads=8 -> dim_head=4
    H4 = 4 * D                            # mlp_ratio=4
    key = jax.random.PRNGKey(0)
    ks = jax.random.split(key, 13)

    x = jax.random.normal(ks[0], (B, N, D), dtype=jnp.float32)
    ln1_w = 1.0 + 0.1 * jax.random.normal(ks[1], (D,), dtype=jnp.float32)
    ln1_b = 0.05 * jax.random.normal(ks[2], (D,), dtype=jnp.float32)
    wq = 0.05 * jax.random.normal(ks[3], (D, D), dtype=jnp.float32)
    wkv = 0.05 * jax.random.normal(ks[4], (2 * D, D), dtype=jnp.float32)
    wp = 0.05 * jax.random.normal(ks[5], (D, D), dtype=jnp.float32)
    bp = 0.05 * jax.random.normal(ks[6], (D,), dtype=jnp.float32)
    ln2_w = 1.0 + 0.1 * jax.random.normal(ks[7], (D,), dtype=jnp.float32)
    ln2_b = 0.05 * jax.random.normal(ks[8], (D,), dtype=jnp.float32)
    w1 = 0.05 * jax.random.normal(ks[9], (H4, D), dtype=jnp.float32)
    b1 = 0.05 * jax.random.normal(ks[10], (H4,), dtype=jnp.float32)
    w2 = 0.05 * jax.random.normal(ks[11], (D, H4), dtype=jnp.float32)
    b2 = 0.05 * jax.random.normal(ks[12], (D,), dtype=jnp.float32)

    params = (ln1_w, ln1_b, wq, wkv, wp, bp, ln2_w, ln2_b, w1, b1, w2, b2)

    out = transformer_forward(x, params, heads=HEADS)
    jax.block_until_ready(out)

    ref = _reference(x, params, heads=HEADS)
    assert out.shape == (B, N, D)
    err = float(jnp.max(jnp.abs(out - ref)))
    assert jnp.allclose(out, ref, atol=2e-3, rtol=2e-3), f"mismatch vs reference, max abs err={err}"
    print("KERNEL_OK")
</pallas_src>

<mosaic_0001>
module attributes {stable_mosaic.version = 11 : i64} {
  func.func @_transformer_kernel(%arg0: i32, %arg1: i32, %arg2: memref<1x8x32xf32, #tpu.memory_space<vmem>>, %arg3: memref<1x8x32xf32, #tpu.memory_space<vmem>>, %arg4: memref<1x32xf32, #tpu.memory_space<vmem>>, %arg5: memref<1x32xf32, #tpu.memory_space<vmem>>, %arg6: memref<32x32xf32, #tpu.memory_space<vmem>>, %arg7: memref<32x64xf32, #tpu.memory_space<vmem>>, %arg8: memref<32x32xf32, #tpu.memory_space<vmem>>, %arg9: memref<1x32xf32, #tpu.memory_space<vmem>>, %arg10: memref<1x32xf32, #tpu.memory_space<vmem>>, %arg11: memref<1x32xf32, #tpu.memory_space<vmem>>, %arg12: memref<32x128xf32, #tpu.memory_space<vmem>>, %arg13: memref<1x128xf32, #tpu.memory_space<vmem>>, %arg14: memref<128x32xf32, #tpu.memory_space<vmem>>, %arg15: memref<1x32xf32, #tpu.memory_space<vmem>>, %arg16: memref<1x8x32xf32, #tpu.memory_space<vmem>>, %arg17: memref<8x32xf32, #tpu.memory_space<vmem>>) attributes {dimension_semantics = [#tpu.dimension_semantics<parallel>, #tpu.dimension_semantics<parallel>], iteration_bounds = array<i64: 2, 1>, scalar_prefetch = 0 : i64, scratch_operands = 1 : i64, tpu.core_type = #tpu.core_type<tc>, window_params = [{transform_indices = @transform_0, window_bounds = array<i64: 1, 8, 32>}, {transform_indices = @transform_1, window_bounds = array<i64: 1, 8, 32>}, {pipeline_mode = #tpu.pipeline_mode<synchronous>, transform_indices = @transform_2, window_bounds = array<i64: 1, 32>}, {pipeline_mode = #tpu.pipeline_mode<synchronous>, transform_indices = @transform_3, window_bounds = array<i64: 1, 32>}, {pipeline_mode = #tpu.pipeline_mode<synchronous>, transform_indices = @transform_4, window_bounds = array<i64: 32, 32>}, {pipeline_mode = #tpu.pipeline_mode<synchronous>, transform_indices = @transform_5, window_bounds = array<i64: 32, 64>}, {pipeline_mode = #tpu.pipeline_mode<synchronous>, transform_indices = @transform_6, window_bounds = array<i64: 32, 32>}, {pipeline_mode = #tpu.pipeline_mode<synchronous>, transform_indices = @transform_7, window_bounds = array<i64: 1, 32>}, {pipeline_mode = #tpu.pipeline_mode<synchronous>, transform_indices = @transform_8, window_bounds = array<i64: 1, 32>}, {pipeline_mode = #tpu.pipeline_mode<synchronous>, transform_indices = @transform_9, window_bounds = array<i64: 1, 32>}, {pipeline_mode = #tpu.pipeline_mode<synchronous>, transform_indices = @transform_10, window_bounds = array<i64: 32, 128>}, {pipeline_mode = #tpu.pipeline_mode<synchronous>, transform_indices = @transform_11, window_bounds = array<i64: 1, 128>}, {pipeline_mode = #tpu.pipeline_mode<synchronous>, transform_indices = @transform_12, window_bounds = array<i64: 128, 32>}, {pipeline_mode = #tpu.pipeline_mode<synchronous>, transform_indices = @transform_13, window_bounds = array<i64: 1, 32>}, {transform_indices = @transform_14, window_bounds = array<i64: 1, 8, 32>}]} {
    %c0 = arith.constant 0 : index
    %c0_0 = arith.constant 0 : index
    %c0_1 = arith.constant 0 : index
    %0 = vector.load %arg2[%c0, %c0_0, %c0_1] : memref<1x8x32xf32, #tpu.memory_space<vmem>>, vector<1x8x32xf32>
    %1 = vector.shape_cast %0 : vector<1x8x32xf32> to vector<8x32xf32>
    %c0_2 = arith.constant 0 : index
    %c0_3 = arith.constant 0 : index
    %c0_4 = arith.constant 0 : index
    %2 = vector.load %arg3[%c0_2, %c0_3, %c0_4] : memref<1x8x32xf32, #tpu.memory_space<vmem>>, vector<1x8x32xf32>
    %3 = vector.shape_cast %2 : vector<1x8x32xf32> to vector<8x32xf32>
    %c0_5 = arith.constant 0 : index
    %c0_6 = arith.constant 0 : index
    %4 = vector.load %arg4[%c0_5, %c0_6] : memref<1x32xf32, #tpu.memory_space<vmem>>, vector<1x32xf32>
    %c0_7 = arith.constant 0 : index
    %c0_8 = arith.constant 0 : index
    %5 = vector.load %arg5[%c0_7, %c0_8] : memref<1x32xf32, #tpu.memory_space<vmem>>, vector<1x32xf32>
    %cst = arith.constant dense<0.000000e+00> : vector<8xf32>
    %6 = vector.multi_reduction <add>, %1, %cst [1] : vector<8x32xf32> to vector<8xf32>
    %7 = vector.shape_cast %6 : vector<8xf32> to vector<8x1xf32>
    %cst_9 = arith.constant 3.200000e+01 : f32
    %8 = vector.broadcast %cst_9 : f32 to vector<8x1xf32>
    %9 = arith.divf %7, %8 : vector<8x1xf32>
    %10 = vector.broadcast %9 : vector<8x1xf32> to vector<8x32xf32>
    %11 = arith.subf %1, %10 : vector<8x32xf32>
    %12 = arith.mulf %11, %11 : vector<8x32xf32>
    %cst_10 = arith.constant dense<0.000000e+00> : vector<8xf32>
    %13 = vector.multi_reduction <add>, %12, %cst_10 [1] : vector<8x32xf32> to vector<8xf32>
    %14 = vector.shape_cast %13 : vector<8xf32> to vector<8x1xf32>
    %cst_11 = arith.constant 3.200000e+01 : f32
    %15 = vector.broadcast %cst_11 : f32 to vector<8x1xf32>
    %16 = arith.divf %14, %15 : vector<8x1xf32>
    %cst_12 = arith.constant 9.99999997E-7 : f32
    %17 = vector.broadcast %cst_12 : f32 to vector<8x1xf32>
    %18 = arith.addf %16, %17 : vector<8x1xf32>
    %19 = math.rsqrt %18 : vector<8x1xf32>
    %20 = vector.broadcast %19 : vector<8x1xf32> to vector<8x32xf32>
    %21 = arith.mulf %11, %20 : vector<8x32xf32>
    %22 = vector.broadcast %4 : vector<1x32xf32> to vector<8x32xf32>
    %23 = arith.mulf %21, %22 : vector<8x32xf32>
    %24 = vector.broadcast %5 : vector<1x32xf32> to vector<8x32xf32>
    %25 = arith.addf %23, %24 : vector<8x32xf32>
    %cst_13 = arith.constant dense<0.000000e+00> : vector<8xf32>
    %26 = vector.multi_reduction <add>, %3, %cst_13 [1] : vector<8x32xf32> to vector<8xf32>
    %27 = vector.shape_cast %26 : vector<8xf32> to vector<8x1xf32>
    %cst_14 = arith.constant 3.200000e+01 : f32
    %28 = vector.broadcast %cst_14 : f32 to vector<8x1xf32>
    %29 = arith.divf %27, %28 : vector<8x1xf32>
    %30 = vector.broadcast %29 : vector<8x1xf32> to vector<8x32xf32>
    %31 = arith.subf %3, %30 : vector<8x32xf32>
    %32 = arith.mulf %31, %31 : vector<8x32xf32>
    %cst_15 = arith.constant dense<0.000000e+00> : vector<8xf32>
    %33 = vector.multi_reduction <add>, %32, %cst_15 [1] : vector<8x32xf32> to vector<8xf32>
    %34 = vector.shape_cast %33 : vector<8xf32> to vector<8x1xf32>
    %cst_16 = arith.constant 3.200000e+01 : f32
    %35 = vector.broadcast %cst_16 : f32 to vector<8x1xf32>
    %36 = arith.divf %34, %35 : vector<8x1xf32>
    %cst_17 = arith.constant 9.99999997E-7 : f32
    %37 = vector.broadcast %cst_17 : f32 to vector<8x1xf32>
    %38 = arith.addf %36, %37 : vector<8x1xf32>
    %39 = math.rsqrt %38 : vector<8x1xf32>
    %40 = vector.broadcast %39 : vector<8x1xf32> to vector<8x32xf32>
    %41 = arith.mulf %31, %40 : vector<8x32xf32>
    %42 = vector.broadcast %4 : vector<1x32xf32> to vector<8x32xf32>
    %43 = arith.mulf %41, %42 : vector<8x32xf32>
    %44 = vector.broadcast %5 : vector<1x32xf32> to vector<8x32xf32>
    %45 = arith.addf %43, %44 : vector<8x32xf32>
    %c0_18 = arith.constant 0 : index
    %c0_19 = arith.constant 0 : index
    %46 = vector.load %arg6[%c0_18, %c0_19] : memref<32x32xf32, #tpu.memory_space<vmem>>, vector<32x32xf32>
    %cst_20 = arith.constant dense<0.000000e+00> : vector<8x32xf32>
    %47 = tpu.matmul %25, %46, %cst_20 {dimension_numbers = #tpu.dot_dimension_numbers<[1], [0], [0], [1], [0, 0, 1, 1], [], []>} : vector<8x32xf32>, vector<32x32xf32>, vector<8x32xf32> -> vector<8x32xf32>
    %c0_21 = arith.constant 0 : index
    %c0_22 = arith.constant 0 : index
    %48 = vector.load %arg7[%c0_21, %c0_22] : memref<32x64xf32, #tpu.memory_space<vmem>>, vector<32x64xf32>
    %cst_23 = arith.constant dense<0.000000e+00> : vector<8x64xf32>
    %49 = tpu.matmul %45, %48, %cst_23 {dimension_numbers = #tpu.dot_dimension_numbers<[1], [0], [0], [1], [0, 0, 1, 1], [], []>} : vector<8x32xf32>, vector<32x64xf32>, vector<8x64xf32> -> vector<8x64xf32>
    %50 = vector.extract_strided_slice %49 {offsets = [0, 0], sizes = [8, 32], strides = [1, 1]} : vector<8x64xf32> to vector<8x32xf32>
    %51 = vector.extract_strided_slice %49 {offsets = [0, 32], sizes = [8, 32], strides = [1, 1]} : vector<8x64xf32> to vector<8x32xf32>
    %52 = vector.extract_strided_slice %47 {offsets = [0, 0], sizes = [8, 4], strides = [1, 1]} : vector<8x32xf32> to vector<8x4xf32>
    %53 = vector.extract_strided_slice %50 {offsets = [0, 0], sizes = [8, 4], strides = [1, 1]} : vector<8x32xf32> to vector<8x4xf32>
    %54 = vector.extract_strided_slice %51 {offsets = [0, 0], sizes = [8, 4], strides = [1, 1]} : vector<8x32xf32> to vector<8x4xf32>
    %cst_24 = arith.constant dense<0.000000e+00> : vector<8x8xf32>
    %55 = tpu.matmul %52, %53, %cst_24 {dimension_numbers = #tpu.dot_dimension_numbers<[1], [1], [0], [0], [0, 0, 1, 0], [], []>} : vector<8x4xf32>, vector<8x4xf32>, vector<8x8xf32> -> vector<8x8xf32>
    %cst_25 = arith.constant dense<0xFF800000> : vector<8xf32>
    %56 = vector.multi_reduction <maximumf>, %55, %cst_25 [1] : vector<8x8xf32> to vector<8xf32>
    %57 = vector.shape_cast %56 : vector<8xf32> to vector<8x1xf32>
    %58 = vector.broadcast %57 : vector<8x1xf32> to vector<8x8xf32>
    %59 = arith.subf %55, %58 : vector<8x8xf32>
    %60 = math.exp %59 : vector<8x8xf32>
    %cst_26 = arith.constant dense<0.000000e+00> : vector<8xf32>
    %61 = vector.multi_reduction <add>, %60, %cst_26 [1] : vector<8x8xf32> to vector<8xf32>
    %62 = vector.shape_cast %61 : vector<8xf32> to vector<8x1xf32>
    %63 = tpu.reciprocal %62 {approx = true} : vector<8x1xf32> -> vector<8x1xf32>
    %64 = vector.broadcast %63 : vector<8x1xf32> to vector<8x8xf32>
    %65 = arith.mulf %60, %64 : vector<8x8xf32>
    %cst_27 = arith.constant dense<0.000000e+00> : vector<8x4xf32>
    %66 = tpu.matmul %65, %54, %cst_27 {dimension_numbers = #tpu.dot_dimension_numbers<[1], [0], [0], [1], [0, 0, 1, 1], [], []>} : vector<8x8xf32>, vector<8x4xf32>, vector<8x4xf32> -> vector<8x4xf32>
    %c0_28 = arith.constant 0 : index
    %c0_29 = arith.constant 0 : index
    %67 = vector.load %arg17[%c0_28, %c0_29] : memref<8x32xf32, #tpu.memory_space<vmem>>, vector<8x4xf32>
    tpu.vector_store %arg17[%c0_28, %c0_29], %66 {strides = array<i32>} : memref<8x32xf32, #tpu.memory_space<vmem>>, vector<8x4xf32>,
    %68 = vector.extract_strided_slice %47 {offsets = [0, 4], sizes = [8, 4], strides = [1, 1]} : vector<8x32xf32> to vector<8x4xf32>
    %69 = vector.extract_strided_slice %50 {offsets = [0, 4], sizes = [8, 4], strides = [1, 1]} : vector<8x32xf32> to vector<8x4xf32>
    %70 = vector.extract_strided_slice %51 {offsets = [0, 4], sizes = [8, 4], strides = [1, 1]} : vector<8x32xf32> to vector<8x4xf32>
    %cst_30 = arith.constant dense<0.000000e+00> : vector<8x8xf32>
    %71 = tpu.matmul %68, %69, %cst_30 {dimension_numbers = #tpu.dot_dimension_numbers<[1], [1], [0], [0], [0, 0, 1, 0], [], []>} : vector<8x4xf32>, vector<8x4xf32>, vector<8x8xf32> -> vector<8x8xf32>
    %cst_31 = arith.constant dense<0xFF800000> : vector<8xf32>
    %72 = vector.multi_reduction <maximumf>, %71, %cst_31 [1] : vector<8x8xf32> to vector<8xf32>
    %73 = vector.shape_cast %72 : vector<8xf32> to vector<8x1xf32>
    %74 = vector.broadcast %73 : vector<8x1xf32> to vector<8x8xf32>
    %75 = arith.subf %71, %74 : vector<8x8xf32>
    %76 = math.exp %75 : vector<8x8xf32>
    %cst_32 = arith.constant dense<0.000000e+00> : vector<8xf32>
    %77 = vector.multi_reduction <add>, %76, %cst_32 [1] : vector<8x8xf32> to vector<8xf32>
    %78 = vector.shape_cast %77 : vector<8xf32> to vector<8x1xf32>
    %79 = tpu.reciprocal %78 {approx = true} : vector<8x1xf32> -> vector<8x1xf32>
    %80 = vector.broadcast %79 : vector<8x1xf32> to vector<8x8xf32>
    %81 = arith.mulf %76, %80 : vector<8x8xf32>
    %cst_33 = arith.constant dense<0.000000e+00> : vector<8x4xf32>
    %82 = tpu.matmul %81, %70, %cst_33 {dimension_numbers = #tpu.dot_dimension_numbers<[1], [0], [0], [1], [0, 0, 1, 1], [], []>} : vector<8x8xf32>, vector<8x4xf32>, vector<8x4xf32> -> vector<8x4xf32>
    %c0_34 = arith.constant 0 : index
    %c4 = arith.constant 4 : index
    %83 = vector.load %arg17[%c0_34, %c4] : memref<8x32xf32, #tpu.memory_space<vmem>>, vector<8x4xf32>
    tpu.vector_store %arg17[%c0_34, %c4], %82 {strides = array<i32>} : memref<8x32xf32, #tpu.memory_space<vmem>>, vector<8x4xf32>,
    %84 = vector.extract_strided_slice %47 {offsets = [0, 8], sizes = [8, 4], strides = [1, 1]} : vector<8x32xf32> to vector<8x4xf32>
    %85 = vector.extract_strided_slice %50 {offsets = [0, 8], sizes = [8, 4], strides = [1, 1]} : vector<8x32xf32> to vector<8x4xf32>
    %86 = vector.extract_strided_slice %51 {offsets = [0, 8], sizes = [8, 4], strides = [1, 1]} : vector<8x32xf32> to vector<8x4xf32>
    %cst_35 = arith.constant dense<0.000000e+00> : vector<8x8xf32>
    %87 = tpu.matmul %84, %85, %cst_35 {dimension_numbers = #tpu.dot_dimension_numbers<[1], [1], [0], [0], [0, 0, 1, 0], [], []>} : vector<8x4xf32>, vector<8x4xf32>, vector<8x8xf32> -> vector<8x8xf32>
    %cst_36 = arith.constant dense<0xFF800000> : vector<8xf32>
    %88 = vector.multi_reduction <maximumf>, %87, %cst_36 [1] : vector<8x8xf32> to vector<8xf32>
    %89 = vector.shape_cast %88 : vector<8xf32> to vector<8x1xf32>
    %90 = vector.broadcast %89 : vector<8x1xf32> to vector<8x8xf32>
    %91 = arith.subf %87, %90 : vector<8x8xf32>
    %92 = math.exp %91 : vector<8x8xf32>
    %cst_37 = arith.constant dense<0.000000e+00> : vector<8xf32>
    %93 = vector.multi_reduction <add>, %92, %cst_37 [1] : vector<8x8xf32> to vector<8xf32>
    %94 = vector.shape_cast %93 : vector<8xf32> to vector<8x1xf32>
    %95 = tpu.reciprocal %94 {approx = true} : vector<8x1xf32> -> vector<8x1xf32>
    %96 = vector.broadcast %95 : vector<8x1xf32> to vector<8x8xf32>
    %97 = arith.mulf %92, %96 : vector<8x8xf32>
    %cst_38 = arith.constant dense<0.000000e+00> : vector<8x4xf32>
    %98 = tpu.matmul %97, %86, %cst_38 {dimension_numbers = #tpu.dot_dimension_numbers<[1], [0], [0], [1], [0, 0, 1, 1], [], []>} : vector<8x8xf32>, vector<8x4xf32>, vector<8x4xf32> -> vector<8x4xf32>
    %c0_39 = arith.constant 0 : index
    %c8 = arith.constant 8 : index
    %99 = vector.load %arg17[%c0_39, %c8] : memref<8x32xf32, #tpu.memory_space<vmem>>, vector<8x4xf32>
    tpu.vector_store %arg17[%c0_39, %c8], %98 {strides = array<i32>} : memref<8x32xf32, #tpu.memory_space<vmem>>, vector<8x4xf32>,
    %100 = vector.extract_strided_slice %47 {offsets = [0, 12], sizes = [8, 4], strides = [1, 1]} : vector<8x32xf32> to vector<8x4xf32>
    %101 = vector.extract_strided_slice %50 {offsets = [0, 12], sizes = [8, 4], strides = [1, 1]} : vector<8x32xf32> to vector<8x4xf32>
    %102 = vector.extract_strided_slice %51 {offsets = [0, 12], sizes = [8, 4], strides = [1, 1]} : vector<8x32xf32> to vector<8x4xf32>
    %cst_40 = arith.constant dense<0.000000e+00> : vector<8x8xf32>
    %103 = tpu.matmul %100, %101, %cst_40 {dimension_numbers = #tpu.dot_dimension_numbers<[1], [1], [0], [0], [0, 0, 1, 0], [], []>} : vector<8x4xf32>, vector<8x4xf32>, vector<8x8xf32> -> vector<8x8xf32>
    %cst_41 = arith.constant dense<0xFF800000> : vector<8xf32>
    %104 = vector.multi_reduction <maximumf>, %103, %cst_41 [1] : vector<8x8xf32> to vector<8xf32>
    %105 = vector.shape_cast %104 : vector<8xf32> to vector<8x1xf32>
    %106 = vector.broadcast %105 : vector<8x1xf32> to vector<8x8xf32>
    %107 = arith.subf %103, %106 : vector<8x8xf32>
    %108 = math.exp %107 : vector<8x8xf32>
    %cst_42 = arith.constant dense<0.000000e+00> : vector<8xf32>
    %109 = vector.multi_reduction <add>, %108, %cst_42 [1] : vector<8x8xf32> to vector<8xf32>
    %110 = vector.shape_cast %109 : vector<8xf32> to vector<8x1xf32>
    %111 = tpu.reciprocal %110 {approx = true} : vector<8x1xf32> -> vector<8x1xf32>
    %112 = vector.broadcast %111 : vector<8x1xf32> to vector<8x8xf32>
    %113 = arith.mulf %108, %112 : vector<8x8xf32>
    %cst_43 = arith.constant dense<0.000000e+00> : vector<8x4xf32>
    %114 = tpu.matmul %113, %102, %cst_43 {dimension_numbers = #tpu.dot_dimension_numbers<[1], [0], [0], [1], [0, 0, 1, 1], [], []>} : vector<8x8xf32>, vector<8x4xf32>, vector<8x4xf32> -> vector<8x4xf32>
    %c0_44 = arith.constant 0 : index
    %c12 = arith.constant 12 : index
    %115 = vector.load %arg17[%c0_44, %c12] : memref<8x32xf32, #tpu.memory_space<vmem>>, vector<8x4xf32>
    tpu.vector_store %arg17[%c0_44, %c12], %114 {strides = array<i32>} : memref<8x32xf32, #tpu.memory_space<vmem>>, vector<8x4xf32>,
    %116 = vector.extract_strided_slice %47 {offsets = [0, 16], sizes = [8, 4], strides = [1, 1]} : vector<8x32xf32> to vector<8x4xf32>
    %117 = vector.extract_strided_slice %50 {offsets = [0, 16], sizes = [8, 4], strides = [1, 1]} : vector<8x32xf32> to vector<8x4xf32>
    %118 = vector.extract_strided_slice %51 {offsets = [0, 16], sizes = [8, 4], strides = [1, 1]} : vector<8x32xf32> to vector<8x4xf32>
    %cst_45 = arith.constant dense<0.000000e+00> : vector<8x8xf32>
    %119 = tpu.matmul %116, %117, %cst_45 {dimension_numbers = #tpu.dot_dimension_numbers<[1], [1], [0], [0], [0, 0, 1, 0], [], []>} : vector<8x4xf32>, vector<8x4xf32>, vector<8x8xf32> -> vector<8x8xf32>
    %cst_46 = arith.constant dense<0xFF800000> : vector<8xf32>
    %120 = vector.multi_reduction <maximumf>, %119, %cst_46 [1] : vector<8x8xf32> to vector<8xf32>
    %121 = vector.shape_cast %120 : vector<8xf32> to vector<8x1xf32>
    %122 = vector.broadcast %121 : vector<8x1xf32> to vector<8x8xf32>
    %123 = arith.subf %119, %122 : vector<8x8xf32>
    %124 = math.exp %123 : vector<8x8xf32>
    %cst_47 = arith.constant dense<0.000000e+00> : vector<8xf32>
    %125 = vector.multi_reduction <add>, %124, %cst_47 [1] : vector<8x8xf32> to vector<8xf32>
    %126 = vector.shape_cast %125 : vector<8xf32> to vector<8x1xf32>
    %127 = tpu.reciprocal %126 {approx = true} : vector<8x1xf32> -> vector<8x1xf32>
    %128 = vector.broadcast %127 : vector<8x1xf32> to vector<8x8xf32>
    %129 = arith.mulf %124, %128 : vector<8x8xf32>
    %cst_48 = arith.constant dense<0.000000e+00> : vector<8x4xf32>
    %130 = tpu.matmul %129, %118, %cst_48 {dimension_numbers = #tpu.dot_dimension_numbers<[1], [0], [0], [1], [0, 0, 1, 1], [], []>} : vector<8x8xf32>, vector<8x4xf32>, vector<8x4xf32> -> vector<8x4xf32>
    %c0_49 = arith.constant 0 : index
    %c16 = arith.constant 16 : index
    %131 = vector.load %arg17[%c0_49, %c16] : memref<8x32xf32, #tpu.memory_space<vmem>>, vector<8x4xf32>
    tpu.vector_store %arg17[%c0_49, %c16], %130 {strides = array<i32>} : memref<8x32xf32, #tpu.memory_space<vmem>>, vector<8x4xf32>,
    %132 = vector.extract_strided_slice %47 {offsets = [0, 20], sizes = [8, 4], strides = [1, 1]} : vector<8x32xf32> to vector<8x4xf32>
    %133 = vector.extract_strided_slice %50 {offsets = [0, 20], sizes = [8, 4], strides = [1, 1]} : vector<8x32xf32> to vector<8x4xf32>
    %134 = vector.extract_strided_slice %51 {offsets = [0, 20], sizes = [8, 4], strides = [1, 1]} : vector<8x32xf32> to vector<8x4xf32>
    %cst_50 = arith.constant dense<0.000000e+00> : vector<8x8xf32>
    %135 = tpu.matmul %132, %133, %cst_50 {dimension_numbers = #tpu.dot_dimension_numbers<[1], [1], [0], [0], [0, 0, 1, 0], [], []>} : vector<8x4xf32>, vector<8x4xf32>, vector<8x8xf32> -> vector<8x8xf32>
    %cst_51 = arith.constant dense<0xFF800000> : vector<8xf32>
    %136 = vector.multi_reduction <maximumf>, %135, %cst_51 [1] : vector<8x8xf32> to vector<8xf32>
    %137 = vector.shape_cast %136 : vector<8xf32> to vector<8x1xf32>
    %138 = vector.broadcast %137 : vector<8x1xf32> to vector<8x8xf32>
    %139 = arith.subf %135, %138 : vector<8x8xf32>
    %140 = math.exp %139 : vector<8x8xf32>
    %cst_52 = arith.constant dense<0.000000e+00> : vector<8xf32>
    %141 = vector.multi_reduction <add>, %140, %cst_52 [1] : vector<8x8xf32> to vector<8xf32>
    %142 = vector.shape_cast %141 : vector<8xf32> to vector<8x1xf32>
    %143 = tpu.reciprocal %142 {approx = true} : vector<8x1xf32> -> vector<8x1xf32>
    %144 = vector.broadcast %143 : vector<8x1xf32> to vector<8x8xf32>
    %145 = arith.mulf %140, %144 : vector<8x8xf32>
    %cst_53 = arith.constant dense<0.000000e+00> : vector<8x4xf32>
    %146 = tpu.matmul %145, %134, %cst_53 {dimension_numbers = #tpu.dot_dimension_numbers<[1], [0], [0], [1], [0, 0, 1, 1], [], []>} : vector<8x8xf32>, vector<8x4xf32>, vector<8x4xf32> -> vector<8x4xf32>
    %c0_54 = arith.constant 0 : index
    %c20 = arith.constant 20 : index
    %147 = vector.load %arg17[%c0_54, %c20] : memref<8x32xf32, #tpu.memory_space<vmem>>, vector<8x4xf32>
    tpu.vector_store %arg17[%c0_54, %c20], %146 {strides = array<i32>} : memref<8x32xf32, #tpu.memory_space<vmem>>, vector<8x4xf32>,
    %148 = vector.extract_strided_slice %47 {offsets = [0, 24], sizes = [8, 4], strides = [1, 1]} : vector<8x32xf32> to vector<8x4xf32>
    %149 = vector.extract_strided_slice %50 {offsets = [0, 24], sizes = [8, 4], strides = [1, 1]} : vector<8x32xf32> to vector<8x4xf32>
    %150 = vector.extract_strided_slice %51 {offsets = [0, 24], sizes = [8, 4], strides = [1, 1]} : vector<8x32xf32> to vector<8x4xf32>
    %cst_55 = arith.constant dense<0.000000e+00> : vector<8x8xf32>
    %151 = tpu.matmul %148, %149, %cst_55 {dimension_numbers = #tpu.dot_dimension_numbers<[1], [1], [0], [0], [0, 0, 1, 0], [], []>} : vector<8x4xf32>, vector<8x4xf32>, vector<8x8xf32> -> vector<8x8xf32>
    %cst_56 = arith.constant dense<0xFF800000> : vector<8xf32>
    %152 = vector.multi_reduction <maximumf>, %151, %cst_56 [1] : vector<8x8xf32> to vector<8xf32>
    %153 = vector.shape_cast %152 : vector<8xf32> to vector<8x1xf32>
    %154 = vector.broadcast %153 : vector<8x1xf32> to vector<8x8xf32>
    %155 = arith.subf %151, %154 : vector<8x8xf32>
    %156 = math.exp %155 : vector<8x8xf32>
    %cst_57 = arith.constant dense<0.000000e+00> : vector<8xf32>
    %157 = vector.multi_reduction <add>, %156, %cst_57 [1] : vector<8x8xf32> to vector<8xf32>
    %158 = vector.shape_cast %157 : vector<8xf32> to vector<8x1xf32>
    %159 = tpu.reciprocal %158 {approx = true} : vector<8x1xf32> -> vector<8x1xf32>
    %160 = vector.broadcast %159 : vector<8x1xf32> to vector<8x8xf32>
    %161 = arith.mulf %156, %160 : vector<8x8xf32>
    %cst_58 = arith.constant dense<0.000000e+00> : vector<8x4xf32>
    %162 = tpu.matmul %161, %150, %cst_58 {dimension_numbers = #tpu.dot_dimension_numbers<[1], [0], [0], [1], [0, 0, 1, 1], [], []>} : vector<8x8xf32>, vector<8x4xf32>, vector<8x4xf32> -> vector<8x4xf32>
    %c0_59 = arith.constant 0 : index
    %c24 = arith.constant 24 : index
    %163 = vector.load %arg17[%c0_59, %c24] : memref<8x32xf32, #tpu.memory_space<vmem>>, vector<8x4xf32>
    tpu.vector_store %arg17[%c0_59, %c24], %162 {strides = array<i32>} : memref<8x32xf32, #tpu.memory_space<vmem>>, vector<8x4xf32>,
    %164 = vector.extract_strided_slice %47 {offsets = [0, 28], sizes = [8, 4], strides = [1, 1]} : vector<8x32xf32> to vector<8x4xf32>
    %165 = vector.extract_strided_slice %50 {offsets = [0, 28], sizes = [8, 4], strides = [1, 1]} : vector<8x32xf32> to vector<8x4xf32>
    %166 = vector.extract_strided_slice %51 {offsets = [0, 28], sizes = [8, 4], strides = [1, 1]} : vector<8x32xf32> to vector<8x4xf32>
    %cst_60 = arith.constant dense<0.000000e+00> : vector<8x8xf32>
    %167 = tpu.matmul %164, %165, %cst_60 {dimension_numbers = #tpu.dot_dimension_numbers<[1], [1], [0], [0], [0, 0, 1, 0], [], []>} : vector<8x4xf32>, vector<8x4xf32>, vector<8x8xf32> -> vector<8x8xf32>
    %cst_61 = arith.constant dense<0xFF800000> : vector<8xf32>
    %168 = vector.multi_reduction <maximumf>, %167, %cst_61 [1] : vector<8x8xf32> to vector<8xf32>
    %169 = vector.shape_cast %168 : vector<8xf32> to vector<8x1xf32>
    %170 = vector.broadcast %169 : vector<8x1xf32> to vector<8x8xf32>
    %171 = arith.subf %167, %170 : vector<8x8xf32>
    %172 = math.exp %171 : vector<8x8xf32>
    %cst_62 = arith.constant dense<0.000000e+00> : vector<8xf32>
    %173 = vector.multi_reduction <add>, %172, %cst_62 [1] : vector<8x8xf32> to vector<8xf32>
    %174 = vector.shape_cast %173 : vector<8xf32> to vector<8x1xf32>
    %175 = tpu.reciprocal %174 {approx = true} : vector<8x1xf32> -> vector<8x1xf32>
    %176 = vector.broadcast %175 : vector<8x1xf32> to vector<8x8xf32>
    %177 = arith.mulf %172, %176 : vector<8x8xf32>
    %cst_63 = arith.constant dense<0.000000e+00> : vector<8x4xf32>
    %178 = tpu.matmul %177, %166, %cst_63 {dimension_numbers = #tpu.dot_dimension_numbers<[1], [0], [0], [1], [0, 0, 1, 1], [], []>} : vector<8x8xf32>, vector<8x4xf32>, vector<8x4xf32> -> vector<8x4xf32>
    %c0_64 = arith.constant 0 : index
    %c28 = arith.constant 28 : index
    %179 = vector.load %arg17[%c0_64, %c28] : memref<8x32xf32, #tpu.memory_space<vmem>>, vector<8x4xf32>
    tpu.vector_store %arg17[%c0_64, %c28], %178 {strides = array<i32>} : memref<8x32xf32, #tpu.memory_space<vmem>>, vector<8x4xf32>,
    %c0_65 = arith.constant 0 : index
    %c0_66 = arith.constant 0 : index
    %180 = vector.load %arg17[%c0_65, %c0_66] : memref<8x32xf32, #tpu.memory_space<vmem>>, vector<8x32xf32>
    %c0_67 = arith.constant 0 : index
    %c0_68 = arith.constant 0 : index
    %181 = vector.load %arg8[%c0_67, %c0_68] : memref<32x32xf32, #tpu.memory_space<vmem>>, vector<32x32xf32>
    %cst_69 = arith.constant dense<0.000000e+00> : vector<8x32xf32>
    %182 = tpu.matmul %180, %181, %cst_69 {dimension_numbers = #tpu.dot_dimension_numbers<[1], [0], [0], [1], [0, 0, 1, 1], [], []>} : vector<8x32xf32>, vector<32x32xf32>, vector<8x32xf32> -> vector<8x32xf32>
    %c0_70 = arith.constant 0 : index
    %c0_71 = arith.constant 0 : index
    %183 = vector.load %arg9[%c0_70, %c0_71] : memref<1x32xf32, #tpu.memory_space<vmem>>, vector<1x32xf32>
    %184 = vector.broadcast %183 : vector<1x32xf32> to vector<8x32xf32>
    %185 = arith.addf %182, %184 : vector<8x32xf32>
    %186 = arith.addf %1, %185 : vector<8x32xf32>
    %c0_72 = arith.constant 0 : index
    %c0_73 = arith.constant 0 : index
    %187 = vector.load %arg10[%c0_72, %c0_73] : memref<1x32xf32, #tpu.memory_space<vmem>>, vector<1x32xf32>
    %c0_74 = arith.constant 0 : index
    %c0_75 = arith.constant 0 : index
    %188 = vector.load %arg11[%c0_74, %c0_75] : memref<1x32xf32, #tpu.memory_space<vmem>>, vector<1x32xf32>
    %cst_76 = arith.constant dense<0.000000e+00> : vector<8xf32>
    %189 = vector.multi_reduction <add>, %186, %cst_76 [1] : vector<8x32xf32> to vector<8xf32>
    %190 = vector.shape_cast %189 : vector<8xf32> to vector<8x1xf32>
    %cst_77 = arith.constant 3.200000e+01 : f32
    %191 = vector.broadcast %cst_77 : f32 to vector<8x1xf32>
    %192 = arith.divf %190, %191 : vector<8x1xf32>
    %193 = vector.broadcast %192 : vector<8x1xf32> to vector<8x32xf32>
    %194 = arith.subf %186, %193 : vector<8x32xf32>
    %195 = arith.mulf %194, %194 : vector<8x32xf32>
    %cst_78 = arith.constant dense<0.000000e+00> : vector<8xf32>
    %196 = vector.multi_reduction <add>, %195, %cst_78 [1] : vector<8x32xf32> to vector<8xf32>
    %197 = vector.shape_cast %196 : vector<8xf32> to vector<8x1xf32>
    %cst_79 = arith.constant 3.200000e+01 : f32
    %198 = vector.broadcast %cst_79 : f32 to vector<8x1xf32>
    %199 = arith.divf %197, %198 : vector<8x1xf32>
    %cst_80 = arith.constant 9.99999997E-7 : f32
    %200 = vector.broadcast %cst_80 : f32 to vector<8x1xf32>
    %201 = arith.addf %199, %200 : vector<8x1xf32>
    %202 = math.rsqrt %201 : vector<8x1xf32>
    %203 = vector.broadcast %202 : vector<8x1xf32> to vector<8x32xf32>
    %204 = arith.mulf %194, %203 : vector<8x32xf32>
    %205 = vector.broadcast %187 : vector<1x32xf32> to vector<8x32xf32>
    %206 = arith.mulf %204, %205 : vector<8x32xf32>
    %207 = vector.broadcast %188 : vector<1x32xf32> to vector<8x32xf32>
    %208 = arith.addf %206, %207 : vector<8x32xf32>
    %c0_81 = arith.constant 0 : index
    %c0_82 = arith.constant 0 : index
    %209 = vector.load %arg12[%c0_81, %c0_82] : memref<32x128xf32, #tpu.memory_space<vmem>>, vector<32x128xf32>
    %cst_83 = arith.constant dense<0.000000e+00> : vector<8x128xf32>
    %210 = tpu.matmul %208, %209, %cst_83 {dimension_numbers = #tpu.dot_dimension_numbers<[1], [0], [0], [1], [0, 0, 1, 1], [], []>} : vector<8x32xf32>, vector<32x128xf32>, vector<8x128xf32> -> vector<8x128xf32>
    %c0_84 = arith.constant 0 : index
    %c0_85 = arith.constant 0 : index
    %211 = vector.load %arg13[%c0_84, %c0_85] : memref<1x128xf32, #tpu.memory_space<vmem>>, vector<1x128xf32>
    %212 = vector.broadcast %211 : vector<1x128xf32> to vector<8x128xf32>
    %213 = arith.addf %210, %212 : vector<8x128xf32>
    %cst_86 = arith.constant 5.000000e-01 : f32
    %214 = vector.broadcast %cst_86 : f32 to vector<8x128xf32>
    %215 = arith.mulf %214, %213 : vector<8x128xf32>
    %cst_87 = arith.constant 4.471500e-02 : f32
    %216 = vector.broadcast %cst_87 : f32 to vector<8x128xf32>
    %217 = arith.mulf %216, %213 : vector<8x128xf32>
    %218 = arith.mulf %217, %213 : vector<8x128xf32>
    %219 = arith.mulf %218, %213 : vector<8x128xf32>
    %220 = arith.addf %213, %219 : vector<8x128xf32>
    %cst_88 = arith.constant 0.797884583 : f32
    %221 = vector.broadcast %cst_88 : f32 to vector<8x128xf32>
    %222 = arith.mulf %221, %220 : vector<8x128xf32>
    %223 = math.tanh %222 : vector<8x128xf32>
    %cst_89 = arith.constant 1.000000e+00 : f32
    %224 = vector.broadcast %cst_89 : f32 to vector<8x128xf32>
    %225 = arith.addf %224, %223 : vector<8x128xf32>
    %226 = arith.mulf %215, %225 : vector<8x128xf32>
    %c0_90 = arith.constant 0 : index
    %c0_91 = arith.constant 0 : index
    %227 = vector.load %arg14[%c0_90, %c0_91] : memref<128x32xf32, #tpu.memory_space<vmem>>, vector<128x32xf32>
    %cst_92 = arith.constant dense<0.000000e+00> : vector<8x32xf32>
    %228 = tpu.matmul %226, %227, %cst_92 {dimension_numbers = #tpu.dot_dimension_numbers<[1], [0], [0], [1], [0, 0, 1, 1], [], []>} : vector<8x128xf32>, vector<128x32xf32>, vector<8x32xf32> -> vector<8x32xf32>
    %c0_93 = arith.constant 0 : index
    %c0_94 = arith.constant 0 : index
    %229 = vector.load %arg15[%c0_93, %c0_94] : memref<1x32xf32, #tpu.memory_space<vmem>>, vector<1x32xf32>
    %230 = vector.broadcast %229 : vector<1x32xf32> to vector<8x32xf32>
    %231 = arith.addf %228, %230 : vector<8x32xf32>
    %232 = arith.addf %186, %231 : vector<8x32xf32>
    %c0_95 = arith.constant 0 : index
    %c0_96 = arith.constant 0 : index
    %c0_97 = arith.constant 0 : index
    %233 = vector.load %arg16[%c0_95, %c0_96, %c0_97] : memref<1x8x32xf32, #tpu.memory_space<vmem>>, vector<1x8x32xf32>
    %234 = vector.shape_cast %233 : vector<1x8x32xf32> to vector<8x32xf32>
    %235 = vector.shape_cast %232 : vector<8x32xf32> to vector<1x8x32xf32>
    tpu.vector_store %arg16[%c0_95, %c0_96, %c0_97], %235 {strides = array<i32>} : memref<1x8x32xf32, #tpu.memory_space<vmem>>, vector<1x8x32xf32>,
    return
  }
  func.func @transform_0(%arg0: i32, %arg1: i32) -> (i32, i32, i32) {
    %c0_i32 = arith.constant 0 : i32
    %c0_i32_0 = arith.constant 0 : i32
    return %arg0, %arg1, %c0_i32 : i32, i32, i32
  }
  func.func @transform_1(%arg0: i32, %arg1: i32) -> (i32, i32, i32) {
    %c0_i32 = arith.constant 0 : i32
    %c0_i32_0 = arith.constant 0 : i32
    %c0_i32_1 = arith.constant 0 : i32
    return %arg0, %c0_i32, %c0_i32_0 : i32, i32, i32
  }
  func.func @transform_2(%arg0: i32, %arg1: i32) -> (i32, i32) {
    %c0_i32 = arith.constant 0 : i32
    %c0_i32_0 = arith.constant 0 : i32
    %c0_i32_1 = arith.constant 0 : i32
    return %c0_i32, %c0_i32_0 : i32, i32
  }
  func.func @transform_3(%arg0: i32, %arg1: i32) -> (i32, i32) {
    %c0_i32 = arith.constant 0 : i32
    %c0_i32_0 = arith.constant 0 : i32
    %c0_i32_1 = arith.constant 0 : i32
    return %c0_i32, %c0_i32_0 : i32, i32
  }
  func.func @transform_4(%arg0: i32, %arg1: i32) -> (i32, i32) {
    %c0_i32 = arith.constant 0 : i32
    %c0_i32_0 = arith.constant 0 : i32
    %c0_i32_1 = arith.constant 0 : i32
    return %c0_i32, %c0_i32_0 : i32, i32
  }
  func.func @transform_5(%arg0: i32, %arg1: i32) -> (i32, i32) {
    %c0_i32 = arith.constant 0 : i32
    %c0_i32_0 = arith.constant 0 : i32
    %c0_i32_1 = arith.constant 0 : i32
    return %c0_i32, %c0_i32_0 : i32, i32
  }
  func.func @transform_6(%arg0: i32, %arg1: i32) -> (i32, i32) {
    %c0_i32 = arith.constant 0 : i32
    %c0_i32_0 = arith.constant 0 : i32
    %c0_i32_1 = arith.constant 0 : i32
    return %c0_i32, %c0_i32_0 : i32, i32
  }
  func.func @transform_7(%arg0: i32, %arg1: i32) -> (i32, i32) {
    %c0_i32 = arith.constant 0 : i32
    %c0_i32_0 = arith.constant 0 : i32
    %c0_i32_1 = arith.constant 0 : i32
    return %c0_i32, %c0_i32_0 : i32, i32
  }
  func.func @transform_8(%arg0: i32, %arg1: i32) -> (i32, i32) {
    %c0_i32 = arith.constant 0 : i32
    %c0_i32_0 = arith.constant 0 : i32
    %c0_i32_1 = arith.constant 0 : i32
    return %c0_i32, %c0_i32_0 : i32, i32
  }
  func.func @transform_9(%arg0: i32, %arg1: i32) -> (i32, i32) {
    %c0_i32 = arith.constant 0 : i32
    %c0_i32_0 = arith.constant 0 : i32
    %c0_i32_1 = arith.constant 0 : i32
    return %c0_i32, %c0_i32_0 : i32, i32
  }
  func.func @transform_10(%arg0: i32, %arg1: i32) -> (i32, i32) {
    %c0_i32 = arith.constant 0 : i32
    %c0_i32_0 = arith.constant 0 : i32
    %c0_i32_1 = arith.constant 0 : i32
    return %c0_i32, %c0_i32_0 : i32, i32
  }
  func.func @transform_11(%arg0: i32, %arg1: i32) -> (i32, i32) {
    %c0_i32 = arith.constant 0 : i32
    %c0_i32_0 = arith.constant 0 : i32
    %c0_i32_1 = arith.constant 0 : i32
    return %c0_i32, %c0_i32_0 : i32, i32
  }
  func.func @transform_12(%arg0: i32, %arg1: i32) -> (i32, i32) {
    %c0_i32 = arith.constant 0 : i32
    %c0_i32_0 = arith.constant 0 : i32
    %c0_i32_1 = arith.constant 0 : i32
    return %c0_i32, %c0_i32_0 : i32, i32
  }
  func.func @transform_13(%arg0: i32, %arg1: i32) -> (i32, i32) {
    %c0_i32 = arith.constant 0 : i32
    %c0_i32_0 = arith.constant 0 : i32
    %c0_i32_1 = arith.constant 0 : i32
    return %c0_i32, %c0_i32_0 : i32, i32
  }
  func.func @transform_14(%arg0: i32, %arg1: i32) -> (i32, i32, i32) {
    %c0_i32 = arith.constant 0 : i32
    %c0_i32_0 = arith.constant 0 : i32
    return %arg0, %arg1, %c0_i32 : i32, i32, i32
  }
}

</mosaic_0001>

<bundles_post_ra>
// kernel: tpu_custom_call.1
= control target key start
LH: loop header
LB: loop body
LE: loop exit
PB: predicated region body
PF: predicated region fallthrough
CT: control target
= control target key end

     0   :  { %s3509_s0 = inlined_call_operand.vmem [shape: f32[2,8,32], index: 0, kind: input, shape index: {}]   ;;  %s3510_s1 = inlined_call_operand.vmem [shape: f32[2,8,32], index: 1, kind: input, shape index: {}]   ;;  %s3511_s2 = inlined_call_operand.vmem [shape: f32[1,32], index: 2, kind: input, shape index: {}]   ;;  %s3512_s3 = inlined_call_operand.vmem [shape: f32[1,32], index: 3, kind: input, shape index: {}]   ;;  %s3513_s4 = inlined_call_operand.vmem [shape: f32[32,32], index: 4, kind: input, shape index: {}]   ;;  %s3514_s5 = inlined_call_operand.vmem [shape: f32[32,64], index: 5, kind: input, shape index: {}]   ;;  %s3515_s6 = inlined_call_operand.vmem [shape: f32[32,32], index: 6, kind: input, shape index: {}]   ;;  %s3516_s7 = inlined_call_operand.vmem [shape: f32[1,32], index: 7, kind: input, shape index: {}]   ;;  %s3517_s8 = inlined_call_operand.vmem [shape: f32[1,32], index: 8, kind: input, shape index: {}]   ;;  %s3518_s9 = inlined_call_operand.vmem [shape: f32[1,32], index: 9, kind: input, shape index: {}]   ;;  %s3519_s10 = inlined_call_operand.vmem [shape: f32[32,128], index: 10, kind: input, shape index: {}]   ;;  %s3520_s11 = inlined_call_operand.vmem [shape: f32[1,128], index: 11, kind: input, shape index: {}]   ;;  %s3521_s12 = inlined_call_operand.vmem [shape: f32[128,32], index: 12, kind: input, shape index: {}]   ;;  %s3522_s13 = inlined_call_operand.vmem [shape: f32[1,32], index: 13, kind: input, shape index: {}]   ;;  %s3523_s14 = inlined_call_operand.hbm [shape: f32[2,8,32], index: 14, kind: output, shape index: {}]  }
   0x1   :  { %3527 = sst [smem:[#allocation9_spill]] %s3509_s0 }
   0x2   :  { %3528 = sst [smem:[#allocation10_spill]] %s3510_s1 }
   0x3   :  { %19 = vsyncpa [#allocation4], 0 }
   0x4   :  { %21 = vsyncpa [#allocation4 + $0x1], 0  ;;  %s3095_s29 = smov 0   ;;  %s3097_s30 = smov 0  }
   0x5   :  { %s3099_s15 = smov 0   ;;  %s3101_s16 = smov 0  }
   0x6   :  { %s3103_s17 = smov 0   ;;  %s3105_s18 = smov 0  }
   0x7 LB: > { %3529 = sst [smem:[#allocation6_spill]] %s2972_s29  ;;  %s2471_s19 = sadd.s32 4294967295, %s2992_s18   ;;  %s2992_s18 = sphi %s3105_s18, %s27_s18   ;;  %s2988_s17 = sphi %s3103_s17, %s3538_s17   ;;  %s2984_s16 = sphi %s3101_s16, %s3537_s16   ;;  %s2980_s15 = sphi %s3099_s15, %s3541_s15   ;;  %s2976_s30 = sphi %s3097_s30, %s3540_s30   ;;  %s2972_s29 = sphi %s3095_s29, %s3539_s29  }
   0x8   : > { %3530 = sst [smem:[#allocation7_spill]] %s2988_s17  ;;  %s2472_s20 = sadd.s32 4294967294, %s2992_s18  }
   0x9   : > { %s39_s21 = sadd.s32 1, %s2988_s17  ;;  %s354_s22 = sadd.s32 1, %s2980_s15 }
   0xa   : > { %p41_p0 = scmp.ge.s32.totalorder %s39_s21, 2  ;;  %p364_p1 = scmp.ne.s32.totalorder %s2980_s15, %s2976_s30 }
   0xb   : > { %p365_p2 = scmp.eq.s32.totalorder %s2471_s19, 1  ;;  %p370_p3 = scmp.ne.s32.totalorder %s2976_s30, %s2972_s29 }
   0xc   : > { %s3543_s21 = smov (%p41_p0, %s39_s21), 0  ;;  %p371_p5 = scmp.eq.s32.totalorder %s2472_s20, 1 }
   0xd   : > { %3531 = sst [smem:[#allocation8_spill]] %s3543_s21  ;;  %p3135_p4 = por %p365_p2, %p364_p1 }
   0xe   : > { %s349_s24 = ssub.s32 %s2988_s17, %s3543_s21  ;;  %p2475_p6 = scmp.ge.s32.totalorder %s2992_s18, 1 }
   0xf   : > { %p352_p7 = scmp.eq.s32.totalorder %s349_s24, 0  ;;  %p3142_p8 = por %p371_p5, %p370_p3 }
  0x10   : > { %p442_p9 = scmp.lt.s32.totalorder %s2992_s18, 3 }
  0x11   : > { %s3148_s26 = scalar_select %p352_p7, %s2980_s15, %s354_s22  }
  0x12   : > { %p443_p10 = pnand %p2475_p6, %p442_p9 }
  0x13   : > { %p494_p11 = scmp.lt.s32.totalorder (!%p443_p10), %s2984_s16, 1  ;;  %vm509_vm0 = vcmask (!%p443_p10), 261120   ;;  %s3534_s0 = sld [smem:[#allocation9_spill]] (!%p443_p10)  ;;  %v553_v14 = vld [vmem:[%s3513_s4] sm:$0xff] (!%p443_p10)  ;;  %v554_v15 = vld [vmem:[%s3513_s4 + $0x8] sm:$0xff] (!%p443_p10)  ;;  %v2994_v17 = vmov (!%p443_p10), 0.0|0.0  }
  0x14   : > { %446 = sbr.rel (%p443_p10) target bundleno = 2611 (0xa33), region = 76  ;;  %s3535_s1 = sld [smem:[#allocation10_spill]] (!%p443_p10)  ;;  %v2747_v16 = vpack.c.bf16 (!%p443_p10), %v554_v15, %v553_v14  ;;  %2746 = vmatprep.subr.bf16.mxu1 (!%p443_p10), %v2994_v17  ;;  %v555_v18 = vld [vmem:[%s3513_s4 + $0x10] sm:$0xff] (!%p443_p10)  ;;  %v556_v19 = vld [vmem:[%s3513_s4 + $0x18] sm:$0xff] (!%p443_p10)  ;;  %vm2995_vm1 = vmmov (!%p443_p10), 0   ;;  %v2996_v21 = vmov (!%p443_p10), 0.0  }
  0x15   : > { %v2750_v20 = vpack.c.bf16 (!%p443_p10), %v556_v19, %v555_v18  ;;  %2595 = vmatprep.mubr.msk.f32.mxu1 (!%p443_p10), %vm2995_vm1, %v2996_v21  ;;  %2609 = vmatprep.subr.mxu0 (!%p443_p10), %v2996_v21  ;;  %v2479_v29 = vld [vmem:[%s3511_s2] ss:$0 sm:$0xff] (!%p443_p10)  ;;  %v631_v32 = vld [vmem:[%s3514_s5 + $0x8] sm:$0xff] (!%p443_p10)  ;;  %v632_v39 = vld [vmem:[%s3514_s5 + $0x10] sm:$0xff] (!%p443_p10)  ;;  %vm707_vm2 = vcmask (!%p443_p10), 31744   ;;  %s2998_s22 = smov (!%p443_p10), 120  }
  0x16   : > { %2748 = vmatpush3.bf16.msra.mxu1 (!%p443_p10), %v2747_v16  ;;  %2611 = vmatprep.mubr.msk.f32.mxu0 (!%p443_p10), %vm2995_vm1, %v2996_v21  ;;  %v630_v31 = vld [vmem:[%s3514_s5] sm:$0xff] (!%p443_p10)  ;;  %v633_v40 = vld [vmem:[%s3514_s5 + $0x18] sm:$0xff] (!%p443_p10)  ;;  %s3001_s19 = smov (!%p443_p10), 108   ;;  %s3002_s20 = smov (!%p443_p10), 104   ;;  %vm784_vm3 = vcmask (!%p443_p10), 64512   ;;  %vm1042_vm4 = vcmask (!%p443_p10), 64544  }
  0x17   : > { %2749 = vmatprep.subr.bf16.mxu1 (!%p443_p10), %v2994_v17  ;;  %v2480_v33 = vld [vmem:[%s3512_s3] ss:$0 sm:$0xff] (!%p443_p10)  ;;  %v2753_v36 = vpack.c.bf16 (!%p443_p10), %v631_v32, %v630_v31  ;;  %v2756_v41 = vpack.c.bf16 (!%p443_p10), %v633_v40, %v632_v39  ;;  %s3003_s24 = smov (!%p443_p10), 100   ;;  %s3005_s17 = smov (!%p443_p10), 92   ;;  %vm1213_vm5 = vcmask (!%p443_p10), 97344   ;;  %vm1384_vm6 = vcmask (!%p443_p10), 130144  }
  0x18   : > { %vm1555_vm7 = vcmask (!%p443_p10), 162944   ;;  %vm1726_vm8 = vcmask (!%p443_p10), 195744   ;;  %vm1897_vm9 = vcmask (!%p443_p10), 228544   ;;  %vm2068_vm10 = vcmask (!%p443_p10), 261344  }
  0x1a   : > { %2751 = vmatpush3.bf16.msra.mxu1 (!%p443_p10), %v2750_v20 }
  0x1b   : > { %s495_s27 = scalar_select %p494_p11, %s2984_s16, 1  ;;  %2752 = vmatprep.subr.bf16.mxu1 %v2994_v17 }
  0x1d   : > { %s2477_s28 = sshll.u32 %s495_s27, 3  ;;  %s2999_s27 = smov 116  }
  0x1e   : > { %s500_s21 = scalar_lea.vmem %s3534_s0, %s2477_s28  ;;  %s504_s29 = scalar_lea.vmem %s3535_s1, %s2477_s28 }
  0x1f   : > { %v3158_v0 = vld [vmem:[%s500_s21] sm:$0xff]  ;;  %s2997_s21 = smov 124   ;;  %s3000_s28 = smov 112  }
  0x20   : > { %v506_v1 = vld [vmem:[%s504_s29] sm:$0xff]  ;;  %v510_v2 = vsel %vm509_vm0, %v3158_v0, 0.0  ;;  %s3004_s29 = smov 96  }
  0x21   : > { %511 = vadd.xlane.f32.xlu0 %v510_v2  ;;  %v538_v3 = vsel %vm509_vm0, %v506_v1, 0.0 }
  0x25   : > { %539 = vadd.xlane.f32.xlu0 %v538_v3 }
  0xae   : > { %v512_v4 = vpop.xlane.xlu0 %511 }
  0xaf   : > { %v514_v5 = vmul.f32 0.03125, %v512_v4 }
  0xb1   : > { %v515_v6 = vsub.f32 %v3158_v0, %v514_v5 }
  0xb2   : > { %v540_v7 = vpop.xlane.xlu0 %539 }
  0xb3   : > { %v541_v8 = vmul.f32 0.03125, %v540_v7  ;;  %v516_v9 = vmul.f32 %v515_v6, %v515_v6 }
  0xb5   : > { %v542_v10 = vsub.f32 %v506_v1, %v541_v8  ;;  %v517_v11 = vsel %vm509_vm0, %v516_v9, 0.0 }
  0xb6   : > { %518 = vadd.xlane.f32.xlu1 %v517_v11 }
  0xb7   : > { %v543_v12 = vmul.f32 %v542_v10, %v542_v10 }
  0xb9   : > { %v544_v13 = vsel %vm509_vm0, %v543_v12, 0.0 }
  0xba   : > { %545 = vadd.xlane.f32.xlu1 %v544_v13 }
 0x143   : > { %v519_v22 = vpop.xlane.xlu1 %518 }
 0x144   : > { %v520_v23 = vmul.f32 0.03125, %v519_v22 }
 0x146   : > { %v521_v24 = vadd.f32 1e-06, %v520_v23 }
 0x147   : > { %v546_v25 = vpop.xlane.xlu1 %545 }
 0x148   : > { %2874 = vrsqrt.f32 %v521_v24  ;;  %v547_v26 = vmul.f32 0.03125, %v546_v25 }
 0x14a   : > { %v548_v27 = vadd.f32 1e-06, %v547_v26 }
 0x14c   : > { %2876 = vrsqrt.f32 %v548_v27 }
 0x152   : > { %v2875_v28 = vpop.eup %2874 }
 0x153   : > { %v523_v30 = vmul.f32 %v2875_v28, %v515_v6 }
 0x155   : > { %v530_v34 = vmul.f32 %v2479_v29, %v523_v30 }
 0x156   : > { %v2877_v35 = vpop.eup %2876 }
 0x157   : > { %v550_v37 = vmul.f32 %v2877_v35, %v542_v10  ;;  %v537_v38 = vadd.f32 %v2480_v33, %v530_v34 }
 0x159   : > { %2596 = vmatmul.mubr.msk.f32.vlgmr.msra.gmra.mrb[0].mxu1 %vm509_vm0, %v537_v38  ;;  %v551_v42 = vmul.f32 %v2479_v29, %v550_v37 }
 0x15a   : > { %2754 = vmatpush3.bf16.msra.mxu1 %v2753_v36  ;;  %2606 = vmatprep.mubr.msk.f32.mxu1 %vm2995_vm1, %v2996_v21 }
 0x15b   : > { %2755 = vmatprep.subr.bf16.mxu1 %v2994_v17  ;;  %v552_v43 = vadd.f32 %v2480_v33, %v551_v42 }
 0x15e   : > { %2757 = vmatpush3.bf16.msra.mxu1 %v2756_v41 }
 0x15f   : > { %2614 = vmatprep.subr.mxu1 %v2996_v21 }
 0x161   : > { %2607 = vmatmul.mubr.msk.f32.vlgmr.msra.gmra.mrb[2].mxu1 %vm509_vm0, %v552_v43 }
 0x162   : > { %2616 = vmatprep.mubr.msk.f32.mxu1 %vm2995_vm1, %v2996_v21 }
 0x22c   : > { %v626_v44 = vpop.f32.mrb[0].mxu1 }
 0x22d   : > { %v2597_v45 = vpop.f32.mrb[1].mxu1  ;;  %873 = vrot.lane.b32.xlu1 %v626_v44, %s2997_s21 }
 0x234   : > { %v3212_v46 = vpop.f32.mrb[2].mxu1 }
 0x235   : > { %1046 = vrot.lane.b32.xlu1 %v3212_v46, %s2998_s22  ;;  %875 = vrot.lane.b32.xlu0 %v3212_v46, %s2997_s21  ;;  %v2608_v47 = vpop.f32.mrb[3].mxu1  ;;  %s3006_s21 = smov 88  }
 0x236   : > { %2610 = vmatpush3.xpose.msk.msra.mxu0 %vm707_vm2, %v3212_v46 }
 0x237   : > { %2619 = vmatprep.subr.mxu0 %v2996_v21 }
 0x239   : > { %2612 = vmatmul.mubr.msk.f32.vlgmr.msra.gmra.mrb[0].mxu0 %vm707_vm2, %v626_v44  ;;  %1044 = vrot.lane.b32.xlu1 %v626_v44, %s2998_s22  ;;  %s3007_s22 = smov 84  }
 0x23a   : > { %1217 = vrot.lane.b32.xlu0 %v3212_v46, %s2999_s27  ;;  %2621 = vmatprep.mubr.msk.f32.mxu0 %vm2995_vm1, %v2996_v21 }
 0x23d   : > { %1215 = vrot.lane.b32.xlu1 %v626_v44, %s2999_s27  ;;  %s3008_s27 = smov 80  }
 0x23e   : > { %1388 = vrot.lane.b32.xlu0 %v3212_v46, %s3000_s28 }
 0x241   : > { %1386 = vrot.lane.b32.xlu1 %v626_v44, %s3000_s28  ;;  %s3009_s28 = smov 76  }
 0x242   : > { %1559 = vrot.lane.b32.xlu0 %v3212_v46, %s3001_s19 }
 0x245   : > { %1557 = vrot.lane.b32.xlu1 %v626_v44, %s3001_s19  ;;  %s3010_s19 = smov 68  }
 0x246   : > { %1730 = vrot.lane.b32.xlu0 %v3212_v46, %s3002_s20 }
 0x249   : > { %1728 = vrot.lane.b32.xlu1 %v626_v44, %s3002_s20  ;;  %s3011_s20 = smov 72  }
 0x24a   : > { %1901 = vrot.lane.b32.xlu0 %v3212_v46, %s3003_s24 }
 0x24d   : > { %1899 = vrot.lane.b32.xlu1 %v626_v44, %s3003_s24  ;;  %s3012_s24 = smov 4  }
 0x29f   : > { %v874_v48 = vpop.permute.xlu1 %873 }
 0x2a7   : > { %v876_v49 = vpop.permute.xlu0 %875  ;;  %v1047_v50 = vpop.permute.xlu1 %1046 }
 0x2a8   : > { %2620 = vmatpush3.xpose.msk.msra.mxu0 %vm707_vm2, %v876_v49 }
 0x2a9   : > { %2629 = vmatprep.subr.mxu0 %v2996_v21 }
 0x2ab   : > { %2622 = vmatmul.mubr.msk.f32.vlgmr.msra.gmra.mrb[2].mxu0 %vm707_vm2, %v874_v48  ;;  %v1045_v51 = vpop.permute.xlu1 %1044 }
 0x2ac   : > { %v1218_v52 = vpop.permute.xlu0 %1217  ;;  %2630 = vmatpush3.xpose.msk.msra.mxu0 %vm707_vm2, %v1047_v50  ;;  %2631 = vmatprep.mubr.msk.f32.mxu0 %vm2995_vm1, %v2996_v21 }
 0x2ad   : > { %2639 = vmatprep.subr.mxu0 %v2996_v21 }
 0x2af   : > { %2632 = vmatmul.mubr.msk.f32.vlgmr.msra.gmra.mrb[4].mxu0 %vm707_vm2, %v1045_v51  ;;  %v1216_v53 = vpop.permute.xlu1 %1215 }
 0x2b0   : > { %v1389_v54 = vpop.permute.xlu0 %1388  ;;  %2640 = vmatpush3.xpose.msk.msra.mxu0 %vm707_vm2, %v1218_v52  ;;  %2641 = vmatprep.mubr.msk.f32.mxu0 %vm2995_vm1, %v2996_v21 }
 0x2b1   : > { %2649 = vmatprep.subr.mxu0 %v2996_v21 }
 0x2b3   : > { %2642 = vmatmul.mubr.msk.f32.vlgmr.msra.gmra.mrb[6].mxu0 %vm707_vm2, %v1216_v53  ;;  %v1387_v55 = vpop.permute.xlu1 %1386 }
 0x2b4   : > { %v1560_v56 = vpop.permute.xlu0 %1559  ;;  %2650 = vmatpush3.xpose.msk.msra.mxu0 %vm707_vm2, %v1389_v54  ;;  %2651 = vmatprep.mubr.msk.f32.mxu0 %vm2995_vm1, %v2996_v21 }
 0x2b5   : > { %2659 = vmatprep.subr.mxu0 %v2996_v21 }
 0x2b7   : > { %2652 = vmatmul.mubr.msk.f32.vlgmr.msra.gmra.mrb[8].mxu0 %vm707_vm2, %v1387_v55  ;;  %v1558_v57 = vpop.permute.xlu1 %1557 }
 0x2b8   : > { %2660 = vmatpush3.xpose.msk.msra.mxu0 %vm707_vm2, %v1560_v56  ;;  %2661 = vmatprep.mubr.msk.f32.mxu0 %vm2995_vm1, %v2996_v21  ;;  %v1731_v58 = vpop.permute.xlu0 %1730 }
 0x2b9   : > { %2669 = vmatprep.subr.mxu0 %v2996_v21 }
 0x2bb   : > { %2662 = vmatmul.mubr.msk.f32.vlgmr.msra.gmra.mrb[10].mxu0 %vm707_vm2, %v1558_v57  ;;  %v1729_v59 = vpop.permute.xlu1 %1728 }
 0x2bc   : > { %2670 = vmatpush3.xpose.msk.msra.mxu0 %vm707_vm2, %v1731_v58  ;;  %2671 = vmatprep.mubr.msk.f32.mxu0 %vm2995_vm1, %v2996_v21  ;;  %v1902_v60 = vpop.permute.xlu0 %1901 }
 0x2bd   : > { %2679 = vmatprep.subr.mxu0 %v2996_v21 }
 0x2bf   : > { %2672 = vmatmul.mubr.msk.f32.vlgmr.msra.gmra.mrb[12].mxu0 %vm707_vm2, %v1729_v59  ;;  %v1900_v61 = vpop.permute.xlu1 %1899 }
 0x2c0   : > { %2680 = vmatpush3.xpose.msk.msra.mxu0 %vm707_vm2, %v1902_v60  ;;  %2681 = vmatprep.mubr.msk.f32.mxu0 %vm2995_vm1, %v2996_v21 }
 0x2c1   : > { %2770 = vmatprep.subr.bf16.mxu0 %v2994_v17 }
 0x2c3   : > { %2682 = vmatmul.mubr.msk.f32.vlgmr.msra.gmra.mrb[14].mxu0 %vm707_vm2, %v1900_v61 }
 0x2c4   : > { %2743 = vmatprep.mubr.msk.f32.mxu0 %vm2995_vm1, %v2996_v21 }
 0x30c   : > { %v780_v62 = vpop.f32.mrb[0].mxu0 }
 0x30d   : > { %v2613_v63 = vpop.f32.mrb[1].mxu0  ;;  %v785_v1 = vsel %vm784_vm3, %v780_v62, -inf }
 0x30e   : > { %786 = vmax.xlane.f32.xlu0 %v785_v1 }
 0x37e   : > { %v947_v2 = vpop.f32.mrb[2].mxu0 }
 0x37f   : > { %v2623_v3 = vpop.f32.mrb[3].mxu0  ;;  %v951_v4 = vsel %vm784_vm3, %v947_v2, -inf }
 0x380   : > { %952 = vmax.xlane.f32.xlu1 %v951_v4 }
 0x382   : > { %v1118_v5 = vpop.f32.mrb[4].mxu0 }
 0x383   : > { %v2633_v6 = vpop.f32.mrb[5].mxu0  ;;  %v1122_v7 = vsel %vm784_vm3, %v1118_v5, -inf }
 0x384   : > { %1123 = vmax.xlane.f32.xlu0 %v1122_v7 }
 0x386   : > { %v1289_v8 = vpop.f32.mrb[6].mxu0 }
 0x387   : > { %v2643_v9 = vpop.f32.mrb[7].mxu0  ;;  %v1293_v10 = vsel %vm784_vm3, %v1289_v8, -inf }
 0x388   : > { %1294 = vmax.xlane.f32.xlu0 %v1293_v10 }
 0x38a   : > { %v1460_v11 = vpop.f32.mrb[8].mxu0 }
 0x38b   : > { %v2653_v12 = vpop.f32.mrb[9].mxu0  ;;  %v1464_v13 = vsel %vm784_vm3, %v1460_v11, -inf }
 0x38c   : > { %1465 = vmax.xlane.f32.xlu0 %v1464_v13 }
 0x38e   : > { %v3267_v14 = vpop.f32.mrb[10].mxu0 }
 0x38f   : > { %v2663_v15 = vpop.f32.mrb[11].mxu0  ;;  %v1635_v16 = vsel %vm784_vm3, %v3267_v14, -inf }
 0x390   : > { %1636 = vmax.xlane.f32.xlu1 %v1635_v16 }
 0x392   : > { %v1802_v18 = vpop.f32.mrb[12].mxu0 }
 0x393   : > { %v2673_v19 = vpop.f32.mrb[13].mxu0  ;;  %v1806_v20 = vsel %vm784_vm3, %v1802_v18, -inf }
 0x394   : > { %1807 = vmax.xlane.f32.xlu0 %v1806_v20 }
 0x396   : > { %v3272_v22 = vpop.f32.mrb[14].mxu0 }
 0x397   : > { %v2683_v23 = vpop.f32.mrb[15].mxu0  ;;  %v1977_v29 = vsel %vm784_vm3, %v3272_v22, -inf }
 0x39b   : > { %v787_v24 = vpop.xlane.xlu0 %786 }
 0x39c   : > { %v788_v25 = vsub.f32 %v780_v62, %v787_v24 }
 0x39e   : > { %v789_v26 = vmul.f32 1.442695, %v788_v25 }
 0x3a0   : > { %2878 = vpow2.f32 %v789_v26 }
 0x3a1   : > { %796 = vrot.lane.b32.xlu1 %v3212_v46, %s3004_s29  ;;  %s3013_s29 = smov 8  }
 0x3aa   : > { %v2879_v27 = vpop.eup %2878 }
 0x3ab   : > { %v791_v28 = vsel %vm784_vm3, %v2879_v27, 0.0 }
 0x3ac   : > { %792 = vadd.xlane.f32.xlu0 %v791_v28 }
 0x3c2   : > { %962 = vrot.lane.b32.xlu0 %v3212_v46, %s3005_s17  ;;  %s3014_s17 = smov 12  }
 0x3c5   : > { %1978 = vmax.xlane.f32.xlu1 %v1977_v29 }
 0x3d6   : > { %1133 = vrot.lane.b32.xlu1 %v3212_v46, %s3006_s21  ;;  %s3015_s21 = smov 16  }
 0x3da   : > { %1304 = vrot.lane.b32.xlu1 %v3212_v46, %s3007_s22  ;;  %s3017_s22 = smov 24  }
 0x3de   : > { %1475 = vrot.lane.b32.xlu1 %v3212_v46, %s3008_s27  ;;  %s3018_s27 = smov 28  }
 0x40d   : > { %v953_v30 = vpop.xlane.xlu1 %952 }
 0x40e   : > { %v954_v31 = vsub.f32 %v947_v2, %v953_v30 }
 0x410   : > { %v955_v32 = vmul.f32 1.442695, %v954_v31 }
 0x411   : > { %v1124_v33 = vpop.xlane.xlu0 %1123 }
 0x412   : > { %2880 = vpow2.f32 %v955_v32  ;;  %v1125_v34 = vsub.f32 %v1118_v5, %v1124_v33 }
 0x414   : > { %v1126_v35 = vmul.f32 1.442695, %v1125_v34 }
 0x415   : > { %v1295_v36 = vpop.xlane.xlu0 %1294 }
 0x416   : > { %2882 = vpow2.f32 %v1126_v35  ;;  %v1296_v37 = vsub.f32 %v1289_v8, %v1295_v36 }
 0x418   : > { %v1297_v38 = vmul.f32 1.442695, %v1296_v37 }
 0x419   : > { %v1466_v39 = vpop.xlane.xlu0 %1465 }
 0x41a   : > { %2884 = vpow2.f32 %v1297_v38  ;;  %v1467_v40 = vsub.f32 %v1460_v11, %v1466_v39 }
 0x41c   : > { %v3282_v41 = vpop.eup %2880  ;;  %v1468_v42 = vmul.f32 1.442695, %v1467_v40 }
 0x41d   : > { %v1637_v43 = vpop.xlane.xlu1 %1636  ;;  %v957_v44 = vsel %vm784_vm3, %v3282_v41, 0.0 }
 0x41e   : > { %2886 = vpow2.f32 %v1468_v42  ;;  %958 = vadd.xlane.f32.xlu1 %v957_v44  ;;  %v1638_v60 = vsub.f32 %v3267_v14, %v1637_v43 }
 0x420   : > { %v3286_v45 = vpop.eup %2882  ;;  %v1639_v63 = vmul.f32 1.442695, %v1638_v60 }
 0x421   : > { %v1808_v47 = vpop.xlane.xlu0 %1807  ;;  %v797_v48 = vpop.permute.xlu1 %796  ;;  %v1128_v49 = vsel %vm784_vm3, %v3286_v45, 0.0 }
 0x422   : > { %v1809_v50 = vsub.f32 %v1802_v18, %v1808_v47  ;;  %1129 = vadd.xlane.f32.xlu0 %v1128_v49  ;;  %2615 = vmatpush3.msra.mxu1 %v797_v48  ;;  %v2071_v47 = vld [vmem:[%s3515_s6] sm:$0xff]  ;;  %v2072_v48 = vld [vmem:[%s3515_s6 + $0x8] sm:$0xff]  ;;  %v2073_v49 = vld [vmem:[%s3515_s6 + $0x10] sm:$0xff] }
 0x423   : > { %2624 = vmatprep.subr.mxu1 %v2996_v21 }
 0x424   : > { %v2885_v51 = vpop.eup %2884  ;;  %v1810_v52 = vmul.f32 1.442695, %v1809_v50  ;;  %v2759_v50 = vpack.c.bf16 %v2072_v48, %v2071_v47  ;;  %v2290_v48 = vld [vmem:[%s3521_s12 + $0x60] sm:$0xff] }
 0x425   : > { %v1299_v53 = vsel %vm784_vm3, %v2885_v51, 0.0 }
 0x426   : > { %2888 = vpow2.f32 %v1810_v52  ;;  %1300 = vadd.xlane.f32.xlu1 %v1299_v53 }
 0x428   : > { %v3292_v54 = vpop.eup %2886 }
 0x429   : > { %v1470_v55 = vsel %vm784_vm3, %v3292_v54, 0.0 }
 0x42a   : > { %1471 = vadd.xlane.f32.xlu0 %v1470_v55 }
 0x430   : > { %v3296_v56 = vpop.eup %2888 }
 0x431   : > { %v1812_v57 = vsel %vm784_vm3, %v3296_v56, 0.0 }
 0x432   : > { %1813 = vadd.xlane.f32.xlu0 %v1812_v57 }
 0x437   : > { %1646 = vrot.lane.b32.xlu1 %v3212_v46, %s3009_s28 }
 0x439   : > { %v793_v58 = vpop.xlane.xlu0 %792 }
 0x43a   : > { %2890 = vrcp.f32 %v793_v58 }
 0x43b   : > { %2892 = vpow2.f32 %v1639_v63 }
 0x43d   : > { %v963_v62 = vpop.permute.xlu0 %962 }
 0x444   : > { %v2891_v59 = vpop.eup %2890 }
 0x445   : > { %v795_v61 = vmul.f32 %v2891_v59, %v2879_v27  ;;  %v2893_v4 = vpop.eup %2892 }
 0x446   : > { %v1641_v5 = vsel %vm784_vm3, %v2893_v4, 0.0 }
 0x447   : > { %2617 = vmatmul.mubr.msk.f32.vlgmr.msra.gmra.mrb[4].mxu1 %vm784_vm3, %v795_v61 }
 0x448   : > { %2625 = vmatpush3.msra.mxu1 %v963_v62  ;;  %2626 = vmatprep.mubr.msk.f32.mxu1 %vm2995_vm1, %v2996_v21 }
 0x449   : > { %2634 = vmatprep.subr.mxu1 %v2996_v21 }
 0x452   : > { %v1979_v1 = vpop.xlane.xlu1 %1978 }
 0x453   : > { %v1980_v2 = vsub.f32 %v3272_v22, %v1979_v1 }
 0x455   : > { %v1981_v3 = vmul.f32 1.442695, %v1980_v2 }
 0x456   : > { %v1134_v8 = vpop.permute.xlu1 %1133 }
 0x457   : > { %2894 = vpow2.f32 %v1981_v3 }
 0x45a   : > { %v1305_v9 = vpop.permute.xlu1 %1304 }
 0x45b   : > { %1642 = vadd.xlane.f32.xlu1 %v1641_v5 }
 0x45e   : > { %v1476_v10 = vpop.permute.xlu1 %1475 }
 0x461   : > { %v3308_v6 = vpop.eup %2894 }
 0x462   : > { %v1983_v7 = vsel %vm784_vm3, %v3308_v6, 0.0 }
 0x463   : > { %1984 = vadd.xlane.f32.xlu0 %v1983_v7 }
 0x46c   : > { %1988 = vrot.lane.b32.xlu1 %v3212_v46, %s3010_s19 }
 0x479   : > { %1817 = vrot.lane.b32.xlu0 %v3212_v46, %s3011_s20 }
 0x4ab   : > { %v959_v11 = vpop.xlane.xlu1 %958 }
 0x4ac   : > { %2896 = vrcp.f32 %v959_v11 }
 0x4af   : > { %v1130_v12 = vpop.xlane.xlu0 %1129 }
 0x4b0   : > { %2898 = vrcp.f32 %v1130_v12 }
 0x4b3   : > { %v1301_v13 = vpop.xlane.xlu1 %1300 }
 0x4b4   : > { %2900 = vrcp.f32 %v1301_v13 }
 0x4b6   : > { %v2897_v14 = vpop.eup %2896 }
 0x4b7   : > { %v961_v15 = vmul.f32 %v2897_v14, %v3282_v41  ;;  %v1472_v16 = vpop.xlane.xlu0 %1471  ;;  %v1647_v24 = vpop.permute.xlu1 %1646  ;;  %v2185_v14 = vld [vmem:[%s3519_s10] sm:$0xff] }
 0x4b8   : > { %2902 = vrcp.f32 %v1472_v16  ;;  %v2187_v16 = vld [vmem:[%s3519_s10 + $0x10] sm:$0xff] }
 0x4b9   : > { %2627 = vmatmul.mubr.msk.f32.vlgmr.msra.gmra.mrb[6].mxu1 %vm784_vm3, %v961_v15 }
 0x4ba   : > { %v2899_v18 = vpop.eup %2898  ;;  %2635 = vmatpush3.msra.mxu1 %v1134_v8  ;;  %2636 = vmatprep.mubr.msk.f32.mxu1 %vm2995_vm1, %v2996_v21 }
 0x4bb   : > { %v1132_v46 = vmul.f32 %v2899_v18, %v3286_v45  ;;  %2644 = vmatprep.subr.mxu1 %v2996_v21  ;;  %v2188_v18 = vld [vmem:[%s3519_s10 + $0x18] sm:$0xff] }
 0x4bd   : > { %2637 = vmatmul.mubr.msk.f32.vlgmr.msra.gmra.mrb[8].mxu1 %vm784_vm3, %v1132_v46  ;;  %v2768_v46 = vpack.c.bf16 %v2188_v18, %v2187_v16 }
 0x4be   : > { %v2901_v19 = vpop.eup %2900  ;;  %2645 = vmatpush3.msra.mxu1 %v1305_v9  ;;  %2646 = vmatprep.mubr.msk.f32.mxu1 %vm2995_vm1, %v2996_v21 }
 0x4bf   : > { %v1303_v20 = vmul.f32 %v2901_v19, %v2885_v51  ;;  %2654 = vmatprep.subr.mxu1 %v2996_v21  ;;  %v1814_v25 = vpop.xlane.xlu0 %1813  ;;  %v2074_v51 = vld [vmem:[%s3515_s6 + $0x18] sm:$0xff]  ;;  %v2278_v19 = vld [vmem:[%s3521_s12] sm:$0xff] }
 0x4c0   : > { %v2762_v52 = vpack.c.bf16 %v2074_v51, %v2073_v49  ;;  %v2291_v49 = vld [vmem:[%s3521_s12 + $0x68] sm:$0xff]  ;;  %v2292_v51 = vld [vmem:[%s3521_s12 + $0x70] sm:$0xff] }
 0x4c1   : > { %2647 = vmatmul.mubr.msk.f32.vlgmr.msra.gmra.mrb[10].mxu1 %vm784_vm3, %v1303_v20  ;;  %v2279_v20 = vld [vmem:[%s3521_s12 + $0x8] sm:$0xff] }
 0x4c2   : > { %v2903_v22 = vpop.eup %2902  ;;  %2655 = vmatpush3.msra.mxu1 %v1476_v10  ;;  %2656 = vmatprep.mubr.msk.f32.mxu1 %vm2995_vm1, %v2996_v21 }
 0x4c3   : > { %v1474_v23 = vmul.f32 %v2903_v22, %v3292_v54  ;;  %2664 = vmatprep.subr.mxu1 %v2996_v21  ;;  %v2771_v22 = vpack.c.bf16 %v2279_v20, %v2278_v19 }
 0x4c5   : > { %2657 = vmatmul.mubr.msk.f32.vlgmr.msra.gmra.mrb[12].mxu1 %vm784_vm3, %v1474_v23  ;;  %2772 = vmatpush3.bf16.msra.mxu0 %v2771_v22 }
 0x4c6   : > { %2665 = vmatpush3.msra.mxu1 %v1647_v24  ;;  %2666 = vmatprep.mubr.msk.f32.mxu1 %vm2995_vm1, %v2996_v21 }
 0x4c7   : > { %2674 = vmatprep.subr.mxu1 %v2996_v21  ;;  %2773 = vmatprep.subr.bf16.mxu0 %v2994_v17 }
 0x4e8   : > { %v1643_v26 = vpop.xlane.xlu1 %1642 }
 0x4e9   : > { %2904 = vrcp.f32 %v1643_v26 }
 0x4ea   : > { %2906 = vrcp.f32 %v1814_v25 }
 0x4ec   : > { %v1989_v33 = vpop.permute.xlu1 %1988 }
 0x4f0   : > { %v1985_v27 = vpop.xlane.xlu0 %1984 }
 0x4f1   : > { %2908 = vrcp.f32 %v1985_v27  ;;  %v2509_v27 = vld [vmem:[%s3517_s8] ss:$0 sm:$0xff] }
 0x4f3   : > { %v2905_v28 = vpop.eup %2904 }
 0x4f4   : > { %v1645_v29 = vmul.f32 %v2905_v28, %v2893_v4  ;;  %v1818_v30 = vpop.permute.xlu0 %1817  ;;  %v2907_v31 = vpop.eup %2906  ;;  %v2507_v4 = vld [vmem:[%s3516_s7] ss:$0 sm:$0xff] }
 0x4f5   : > { %v1816_v32 = vmul.f32 %v2907_v31, %v3296_v56 }
 0x4f6   : > { %2667 = vmatmul.mubr.msk.f32.vlgmr.msra.gmra.mrb[14].mxu1 %vm784_vm3, %v1645_v29  ;;  %v2510_v29 = vld [vmem:[%s3518_s9] ss:$0 sm:$0xff] }
 0x4f7   : > { %2675 = vmatpush3.msra.mxu1 %v1818_v30  ;;  %2676 = vmatprep.mubr.msk.f32.mxu1 %vm2995_vm1, %v2996_v21 }
 0x4f8   : > { %2684 = vmatprep.subr.mxu1 %v2996_v21 }
 0x4fa   : > { %2677 = vmatmul.mubr.msk.f32.vlgmr.msra.gmra.mrb[16].mxu1 %vm784_vm3, %v1816_v32  ;;  %v2280_v32 = vld [vmem:[%s3521_s12 + $0x10] sm:$0xff] }
 0x4fb   : > { %v2909_v34 = vpop.eup %2908  ;;  %2685 = vmatpush3.msra.mxu1 %v1989_v33  ;;  %2686 = vmatprep.mubr.msk.f32.mxu1 %vm2995_vm1, %v2996_v21  ;;  %v2281_v33 = vld [vmem:[%s3521_s12 + $0x18] sm:$0xff] }
 0x4fc   : > { %v1987_v35 = vmul.f32 %v2909_v34, %v3308_v6  ;;  %2758 = vmatprep.subr.bf16.mxu1 %v2994_v17  ;;  %v2774_v34 = vpack.c.bf16 %v2281_v33, %v2280_v32 }
 0x4fe   : > { %2687 = vmatmul.mubr.msk.f32.vlgmr.msra.gmra.mrb[18].mxu1 %vm784_vm3, %v1987_v35  ;;  %2775 = vmatpush3.bf16.msra.mxu0 %v2774_v34  ;;  %v2282_v35 = vld [vmem:[%s3521_s12 + $0x20] sm:$0xff] }
 0x4ff   : > { %2697 = vmatprep.mubr.msk.f32.mxu1 %vm2995_vm1, %v2996_v21  ;;  %2760 = vmatpush3.bf16.msra.mxu1 %v2759_v50  ;;  %v2789_v50 = vpack.c.bf16 %v2291_v49, %v2290_v48 }
 0x500   : > { %2761 = vmatprep.subr.bf16.mxu1 %v2994_v17  ;;  %2776 = vmatprep.subr.bf16.mxu0 %v2994_v17 }
 0x503   : > { %2763 = vmatpush3.bf16.msra.mxu1 %v2762_v52  ;;  %v2293_v52 = vld [vmem:[%s3521_s12 + $0x78] sm:$0xff] }
 0x504   : > { %2764 = vmatprep.subr.bf16.mxu1 %v2994_v17 }
 0x51a   : > { %v868_v36 = vpop.f32.mrb[4].mxu1 }
 0x51b   : > { %872 = vst.msk [vmem:[#allocation2] sm:$0xff] %vm707_vm2, %v868_v36  ;;  %v2618_v37 = vpop.f32.mrb[5].mxu1  ;;  %v2283_v36 = vld [vmem:[%s3521_s12 + $0x28] sm:$0xff] }
 0x51c   : > { %v2777_v37 = vpack.c.bf16 %v2283_v36, %v2282_v35 }
 0x51e   : > { %2778 = vmatpush3.bf16.msra.mxu0 %v2777_v37 }
 0x51f   : > { %2779 = vmatprep.subr.bf16.mxu0 %v2994_v17 }
 0x58c   : > { %v1034_v38 = vpop.f32.mrb[6].mxu1 }
 0x58d   : > { %1039 = vrot.lane.b32.xlu0 %v1034_v38, %s3012_s24  ;;  %v2628_v39 = vpop.f32.mrb[7].mxu1  ;;  %v2284_v38 = vld [vmem:[%s3521_s12 + $0x30] sm:$0xff]  ;;  %s491_s24 = sand.u32 1, %s2976_s30  }
 0x58e   : > { %v2285_v39 = vld [vmem:[%s3521_s12 + $0x38] sm:$0xff] }
 0x590   : > { %v1205_v40 = vpop.f32.mrb[8].mxu1 }
 0x591   : > { %1210 = vrot.lane.b32.xlu1 %v1205_v40, %s3013_s29  ;;  %v2638_v41 = vpop.f32.mrb[9].mxu1  ;;  %v2780_v40 = vpack.c.bf16 %v2285_v39, %v2284_v38  ;;  %s2476_s29 = sshll.u32 %s491_s24, 3 }
 0x592   : > { %v2286_v41 = vld [vmem:[%s3521_s12 + $0x40] sm:$0xff] }
 0x593   : > { %2781 = vmatpush3.bf16.msra.mxu0 %v2780_v40 }
 0x594   : > { %v1376_v42 = vpop.f32.mrb[10].mxu1  ;;  %2782 = vmatprep.subr.bf16.mxu0 %v2994_v17 }
 0x595   : > { %1381 = vrot.lane.b32.xlu0 %v1376_v42, %s3014_s17  ;;  %v2648_v43 = vpop.f32.mrb[11].mxu1  ;;  %v2287_v42 = vld [vmem:[%s3521_s12 + $0x48] sm:$0xff]  ;;  %s2374_s17 = scalar_lea.sflag [#allocation4], %s491_s24 }
 0x596   : > { %v2783_v43 = vpack.c.bf16 %v2287_v42, %v2286_v41 }
 0x598   : > { %v1547_v44 = vpop.f32.mrb[12].mxu1  ;;  %2784 = vmatpush3.bf16.msra.mxu0 %v2783_v43 }
 0x599   : > { %1552 = vrot.lane.b32.xlu1 %v1547_v44, %s3015_s21  ;;  %v2658_v45 = vpop.f32.mrb[13].mxu1  ;;  %s3016_s21 = smov 20   ;;  %v2288_v44 = vld [vmem:[%s3521_s12 + $0x50] sm:$0xff]  ;;  %2785 = vmatprep.subr.bf16.mxu0 %v2994_v17 }
 0x59a   : > { %v2289_v45 = vld [vmem:[%s3521_s12 + $0x58] sm:$0xff] }
 0x59b   : > { %v2786_v47 = vpack.c.bf16 %v2289_v45, %v2288_v44 }
 0x59d   : > { %2787 = vmatpush3.bf16.msra.mxu0 %v2786_v47 }
 0x59e   : > { %2788 = vmatprep.subr.bf16.mxu0 %v2994_v17 }
 0x5a1   : > { %2790 = vmatpush3.bf16.msra.mxu0 %v2789_v50 }
 0x5a2   : > { %2791 = vmatprep.subr.bf16.mxu0 %v2994_v17 }
 0x5c9   : > { %v1718_v53 = vpop.f32.mrb[14].mxu1 }
 0x5ca   : > { %1723 = vrot.lane.b32.xlu0 %v1718_v53, %s3016_s21  ;;  %v2668_v54 = vpop.f32.mrb[15].mxu1  ;;  %v2792_v53 = vpack.c.bf16 %v2293_v52, %v2292_v51 }
 0x5cb   : > { %v2511_v54 = vld [vmem:[%s3520_s11] ss:$0 sm:$0xff] }
 0x5cc   : > { %2793 = vmatpush3.bf16.msra.mxu0 %v2792_v53 }
 0x5cd   : > { %v1889_v55 = vpop.f32.mrb[16].mxu1 }
 0x5ce   : > { %1894 = vrot.lane.b32.xlu1 %v1889_v55, %s3017_s22  ;;  %v2678_v56 = vpop.f32.mrb[17].mxu1  ;;  %s2515_s22 = sshll.u32 %s2984_s16, 7 }
 0x5cf   : > { %s3461_s0 = scalar_lea.hbm %s3523_s14, %s2515_s22 }
 0x5d1   : > { %v2060_v57 = vpop.f32.mrb[18].mxu1 }
 0x5d2   : > { %2065 = vrot.lane.b32.xlu0 %v2060_v57, %s3018_s27  ;;  %v2688_v58 = vpop.f32.mrb[19].mxu1  ;;  %s493_s27 = scalar_lea.vmem [#allocation3], %s2476_s29  ;;  %s3019_s29 = smov [#allocation3]  }
 0x5d3   : > { %s2388_s28 = sshll.u32 %s493_s27, 4  ;;  %s2918_s21 = sshll.u32 %s3019_s29, 4  ;;  %s3463_s28 = int_to_ptr.vmem [resolvable:$true] %s2388_s28  ;;  %s2919_s21 = int_to_ptr.vmem [resolvable:$false] %s2918_s21 }
 0x5d4   : > { %s2914_s16 = scalar_lea.vmem %s3463_s28, 128  ;;  %s2920_s1 = scalar_lea.vmem %s2919_s21, 256 }
 0x5d5   : > { %p2915_p12 = scmp.ne.s32.totalorder %s3463_s28, %s2914_s16  ;;  %p2921_p1 = scmp.lt.s32.totalorder %s3463_s28, %s2919_s21 }
 0x5d6   : > { %p2922_p2 = scmp.lt.s32.totalorder %s2920_s1, %s2914_s16 }
 0x5d7   : > { %p2916_p13 = pnand %p2915_p12, %p3135_p4 }
 0x5d8   : > { %p2923_p3 = por %p2922_p2, %p2921_p1 }
 0x5d9   : > { %p2917_p0 = pneg %p2916_p13 }
 0x5db   : > { %p2924_p5 = pnand %p2923_p3, %p2917_p0 }
 0x5ff   : > { %v1040_v59 = vpop.permute.xlu0 %1039 }
 0x600   : > { %1043 = vst.msk [vmem:[#allocation2] sm:$0xff] %vm1042_vm4, %v1040_v59 }
 0x603   : > { %v1211_v60 = vpop.permute.xlu1 %1210 }
 0x604   : > { %1214 = vst.msk [vmem:[#allocation2] sm:$0xff] %vm1213_vm5, %v1211_v60 }
 0x607   : > { %v1382_v61 = vpop.permute.xlu0 %1381 }
 0x608   : > { %1385 = vst.msk [vmem:[#allocation2] sm:$0xff] %vm1384_vm6, %v1382_v61 }
 0x60b   : > { %v1553_v62 = vpop.permute.xlu1 %1552 }
 0x60c   : > { %1556 = vst.msk [vmem:[#allocation2] sm:$0xff] %vm1555_vm7, %v1553_v62 }
 0x63c   : > { %v1724_v63 = vpop.permute.xlu0 %1723 }
 0x63d   : > { %1727 = vst.msk [vmem:[#allocation2] sm:$0xff] %vm1726_vm8, %v1724_v63 }
 0x640   : > { %v1895_v1 = vpop.permute.xlu1 %1894 }
 0x641   : > { %1898 = vst.msk [vmem:[#allocation2] sm:$0xff] %vm1897_vm9, %v1895_v1 }
 0x644   : > { %v2066_v2 = vpop.permute.xlu0 %2065 }
 0x645   : > { %2069 = vst.msk [vmem:[#allocation2] sm:$0xff] %vm2068_vm10, %v2066_v2 }
 0x64c   : > { %v2070_v3 = vld [vmem:[#allocation2] sm:$0xff] }
 0x64d   : > { %2698 = vmatmul.mubr.msk.f32.vlgmr.msra.gmra.mrb[20].mxu1 %vm509_vm0, %v2070_v3  ;;  %v2513_v3 = vld [vmem:[%s3522_s13] ss:$0 sm:$0xff] }
 0x64e   : > { %2708 = vmatprep.mubr.msk.f32.mxu1 %vm2995_vm1, %v2996_v21 }
 0x720   : > { %v2151_v5 = vpop.f32.mrb[20].mxu1 }
 0x721   : > { %v2152_v6 = vadd.f32 %v2507_v4, %v2151_v5  ;;  %v2699_v7 = vpop.f32.mrb[21].mxu1 }
 0x723   : > { %v3368_v8 = vadd.f32 %v2152_v6, %v3158_v0  ;;  %v2186_v0 = vld [vmem:[%s3519_s10 + $0x8] sm:$0xff] }
 0x724   : > { %v2765_v15 = vpack.c.bf16 %v2186_v0, %v2185_v14 }
 0x725   : > { %v2158_v9 = vsel %vm509_vm0, %v3368_v8, 0.0 }
 0x726   : > { %2159 = vadd.xlane.f32.xlu1 %v2158_v9  ;;  %2766 = vmatpush3.bf16.msra.mxu1 %v2765_v15 }
 0x727   : > { %2767 = vmatprep.subr.bf16.mxu1 %v2994_v17 }
 0x72a   : > { %2769 = vmatpush3.bf16.msra.mxu1 %v2768_v46 }
 0x7b3   : > { %v2160_v10 = vpop.xlane.xlu1 %2159 }
 0x7b4   : > { %v2161_v11 = vmul.f32 0.03125, %v2160_v10 }
 0x7b6   : > { %v2162_v12 = vsub.f32 %v3368_v8, %v2161_v11 }
 0x7b8   : > { %v2163_v13 = vmul.f32 %v2162_v12, %v2162_v12 }
 0x7ba   : > { %v2164_v21 = vsel %vm509_vm0, %v2163_v13, 0.0 }
 0x7bb   : > { %2165 = vadd.xlane.f32.xlu0 %v2164_v21 }
 0x848   : > { %v2166_v23 = vpop.xlane.xlu0 %2165 }
 0x849   : > { %v2167_v24 = vmul.f32 0.03125, %v2166_v23 }
 0x84b   : > { %v2168_v25 = vadd.f32 1e-06, %v2167_v24 }
 0x84d   : > { %2910 = vrsqrt.f32 %v2168_v25 }
 0x857   : > { %v2911_v26 = vpop.eup %2910 }
 0x858   : > { %v2170_v28 = vmul.f32 %v2911_v26, %v2162_v12 }
 0x85a   : > { %v2177_v30 = vmul.f32 %v2509_v27, %v2170_v28 }
 0x85c   : > { %v2184_v31 = vadd.f32 %v2510_v29, %v2177_v30 }
 0x85e   : > { %2709 = vmatmul.mubr.msk.f32.vlgmr.msra.gmra.mrb[22].mxu1 %vm509_vm0, %v2184_v31 }
 0x931   : > { %v2265_v55 = vpop.f32.mrb[22].mxu1 }
 0x932   : > { %v2266_v56 = vadd.f32 %v2511_v54, %v2265_v55  ;;  %v2710_v57 = vpop.f32.mrb[23].mxu1 }
 0x934   : > { %v2270_v58 = vmul.f32 0.044715, %v2266_v56  ;;  %v2269_v1 = vmul.f32 0.5, %v2266_v56 }
 0x936   : > { %v2271_v59 = vmul.f32 %v2270_v58, %v2266_v56 }
 0x938   : > { %v2272_v60 = vmul.f32 %v2271_v59, %v2266_v56 }
 0x93a   : > { %v2273_v61 = vadd.f32 %v2272_v60, %v2266_v56 }
 0x93c   : > { %v2274_v62 = vmul.f32 0.7978846, %v2273_v61 }
 0x93e   : > { %2912 = vtanh.f32 %v2274_v62 }
 0x948   : > { %v2913_v63 = vpop.eup %2912 }
 0x949   : > { %v2276_v2 = vadd.f32 1.0, %v2913_v63 }
 0x94b   : > { %v2277_v17 = vmul.f32 %v2276_v2, %v2269_v1 }
 0x94d   : > { %2744 = vmatmul.mubr.f32.vlgmr.msra.gmra.mrb[16].mxu0 %v2277_v17 }
 0xa20   : > { %v2367_v4 = vpop.f32.mrb[16].mxu0 }
 0xa21   : > { %v2368_v5 = vadd.f32 %v2513_v3, %v2367_v4  ;;  %v2745_v6 = vpop.f32.mrb[17].mxu0 }
 0xa23   : > { %v2371_v7 = vadd.f32 %v2368_v5, %v3368_v8 }
 0xa25   : > { %2372 = vst.msk [vmem:[%s493_s27] sm:$0xff] %vm509_vm0, %v2371_v7 }
 0xa26   : > { %2927 = shalt.err (!%p2924_p5)
}
 0xa27   : > { %s2928_s24 = scalar_lea.hbm %s3461_s0, 128  ;;  %s2932_s19 = scalar_lea.hbm %s3523_s14, 256 }
 0xa28   : > { %p2929_p6 = scmp.ne.s32.totalorder %s3461_s0, %s2928_s24  ;;  %p2933_p10 = scmp.lt.u32.totalorder %s3461_s0, %s3523_s14 }
 0xa29   : > { %p2934_p11 = scmp.lt.u32.totalorder %s2932_s19, %s2928_s24  ;;  %p2936_p13 = scmp.lt.u32.totalorder %s2928_s24, %s3461_s0 }
 0xa2a   : > { %p2930_p7 = pnand %p2929_p6, %p3135_p4 }
 0xa2b   : > { %p2935_p12 = por %p2934_p11, %p2933_p10 }
 0xa2c   : > { %p2931_p9 = pneg %p2930_p7 }
 0xa2d   : > { %p2937_p0 = por %p2936_p13, %p2935_p12 }
 0xa2f   : > { %p2938_p1 = pnand %p2937_p0, %p2931_p9 }
 0xa31   : > { %2941 = shalt.err (!%p2938_p1)
}
 0xa32   : > { %2794 = dma.vmem_to_hbm [thread:$0]  (%p3135_p4), %s3463_s28, 128, %s3461_s0, %s2374_s17  }
 0xa33 PF: > { %s3536_s1 = sld [smem:[#allocation6_spill]]  ;;  %p2800_p2 = scmp.ge.s32.totalorder %s2992_s18, 2 }
 0xa35   : > { %p2797_p3 = pnand %p2800_p2, %p3142_p8 }
 0xa39   : > { %s2400_s16 = sand.u32 1, %s3536_s1  }
 0xa3a   : > { %s2401_s21 = scalar_lea.sflag [#allocation4], %s2400_s16 }
 0xa3b   : > { %2967 = dma.done.wait (!%p2797_p3), %s2401_s21, 128  }
 0xa3c   : > { %2969 = vsyncadd (!%p2797_p3), %s2401_s21, 4294967168  ;;  %s27_s18 = sadd.s32 1, %s2992_s18   ;;  %s3537_s16 = sld [smem:[#allocation7_spill]] }
 0xa3d   : > { %p24_p5 = scmp.ge.s32.totalorder %s27_s18, 4   ;;  %s3538_s17 = sld [smem:[#allocation8_spill]] }
 0xa3e   : > { %s3539_s29 = smov %s2976_s30  ;;  %s3540_s30 = smov %s2980_s15 }
 0xa3f   : > { %s3541_s15 = smov %s3148_s26  ;;  %26 = sbr.rel (!%p24_p5) target bundleno = 7 (0x7), region = 114 }
 0xa46   :  { %2406 = vsyncpa [#allocation4], 1 }
 0xa47   :  { %2408 = vsyncpa [#allocation4 + $0x1], 1 }

</bundles_post_ra>
